<compile_context>
chip_gen: v5e
topology: v5e:2x2
jax: 0.10.0
libtpu: 0.0.40
codegen_flags: <defaults>
</compile_context>

<pallas_src>
import functools

import numpy as np
import jax
import jax.numpy as jnp
from jax import lax
from jax.experimental import pallas as pl
from jax.experimental.pallas import tpu as pltpu

NUM_ATOMS = 9
BOND_TYPES = 3
ACTION_SPACE_LENGTH = 3 * NUM_ATOMS * NUM_ATOMS  # 243


# ----------------------------------------------------------------------------
# Fused Pallas kernel (one grid step == one stacked molecule-batch instance)
# ----------------------------------------------------------------------------
def fused_forward_kernel(x_ref, a_ref, lv_ref, mask_ref, sel_ref,
                         seli_ref, selj_ref,
                         wg_ref, bg_ref, wv1_ref, bv1_ref, wv2_ref, bv2_ref,
                         w2p_ref, b2_ref, wf_ref, bf_ref,
                         probs_ref, readout_ref):
    f32 = jnp.float32
    N = x_ref.shape[1]
    B = lv_ref.shape[1]
    A = mask_ref.shape[2]
    hid = w2p_ref.shape[0]
    P = N * N

    x = x_ref[0]          # (N, D)
    a = a_ref[0]          # (N, N)
    lv = lv_ref[0]        # (B, N)
    mask = mask_ref[0]    # (B, A)
    sel = sel_ref[0]      # (B, A) int32

    # ---- GCN: H = relu(A_hat @ X @ W + b) ------------------------------------
    ax = jnp.dot(a, x, preferred_element_type=f32)
    h = jnp.maximum(
        jnp.dot(ax, wg_ref[...], preferred_element_type=f32) + bg_ref[...], 0.0)

    # ---- value head: sum-pool -> fcv_1 (relu) -> fcv_2 ------------------------
    pooled = jnp.dot(lv, h, preferred_element_type=f32)                      # (B, hid)
    zv = jnp.maximum(
        jnp.dot(pooled, wv1_ref[...], preferred_element_type=f32) + bv1_ref[...], 0.0)
    readout_ref[0] = (
        jnp.dot(zv, wv2_ref[...], preferred_element_type=f32) + bv2_ref[...])

    # ---- pairwise action MLP via exact U+V decomposition ----------------------
    # w2p = [W2[:hid,:] | W2[hid:,:]]: one matmul feeds both halves.
    uv = jnp.dot(h, w2p_ref[...], preferred_element_type=f32)                # (N, 2*hid)
    u = uv[:, :hid]                                                          # H @ W2_top
    v = uv[:, hid:]                                                          # H @ W2_bot
    # sel_i / sel_j are static (P, N) one-hot selectors (precomputed in the
    # wrapper): pair p = i*N + j picks u[i] + v[j] via two tiny MXU pushes.
    pair = (jnp.dot(seli_ref[...], u, preferred_element_type=f32)
            + jnp.dot(selj_ref[...], v, preferred_element_type=f32)
            + b2_ref[...])                                                   # (P, hid)
    zz = jnp.maximum(pair, 0.0)
    sa = jnp.dot(zz, wf_ref[...], preferred_element_type=f32) + bf_ref[...]  # (P, 3)
    # NOTE: the len_matrix multiply is subsumed by the intra-graph packing
    # below: packed source positions are exactly those with len_matrix == 1.

    # ---- per-graph packing + indexmask gather + batched masked softmax --------
    # sel[g, t] = flat (N*N*3) source index feeding output slot t of graph g
    # (static packing composed with indexmask), or -1 meaning "no source" -> 0.
    flat_r = lax.broadcasted_iota(jnp.int32, (P, A), 0)        # pair-row index
    base = flat_r * BOND_TYPES
    targets = [base + b for b in range(BOND_TYPES)]            # hoisted out of g-loop
    sa_cols = [sa[:, b:b + 1] for b in range(BOND_TYPES)]      # hoisted out of g-loop
    row_pick = lax.broadcasted_iota(jnp.int32, (B, P), 0)

    logits = mask                                                            # (B, A)
    for g in range(B):                                          # B static & tiny
        sel_g = sel[g:g + 1, :]                                              # (1, A)
        masked = (sel_g == targets[0]).astype(f32) * sa_cols[0]              # (P, A)
        for b in range(1, BOND_TYPES):
            masked = masked + (sel_g == targets[b]).astype(f32) * sa_cols[b]
        # Contract the P rows on the MXU (instead of a cross-sublane VPU/XLU
        # reduction); pick_g routes the (1-row) result into output row g.
        pick_g = (row_pick == g).astype(f32)                                 # (B, P)
        logits = logits + jnp.dot(pick_g, masked, preferred_element_type=f32)

    # one batched softmax + one lane-dense store
    logits = logits - jnp.max(logits, axis=-1, keepdims=True)
    e = jnp.exp(logits)
    probs_ref[0] = e / jnp.sum(e, axis=-1, keepdims=True)


# ----------------------------------------------------------------------------
# Static tables (pure functions of the static graph-size layout)
# ----------------------------------------------------------------------------
def _pack_source_table(batch_num_nodes, num_nodes):
    """pack_src[g, k] = flat (N*N*3) index feeding packed slot k of graph g, or -1."""
    B = len(batch_num_nodes)
    tbl = np.full((B, ACTION_SPACE_LENGTH), -1, dtype=np.int32)
    off = 0
    for g, n in enumerate(batch_num_nodes):
        k = 0
        for i in range(n):
            for j in range(n):
                for b in range(BOND_TYPES):
                    tbl[g, k] = ((off + i) * num_nodes + (off + j)) * BOND_TYPES + b
                    k += 1
        off += n
    return tbl


def _pair_selector_tables(num_nodes):
    """sel_i[p, c] = [c == p // N]; sel_j[p, c] = [c == p % N]  (f32 one-hots)."""
    N = num_nodes
    P = N * N
    sel_i = np.zeros((P, N), np.float32)
    sel_j = np.zeros((P, N), np.float32)
    for i in range(N):
        for j in range(N):
            p = i * N + j
            sel_i[p, i] = 1.0
            sel_j[p, j] = 1.0
    return sel_i, sel_j


# ----------------------------------------------------------------------------
# Wrappers
# ----------------------------------------------------------------------------
def forward_stacked(x, a_hat, len_vec, mask, indexmask, params, *, batch_num_nodes):
    """Stacked forward.  Shapes: x (S,N,D), a_hat (S,N,N), len_vec (S,B,N),
    mask (S,B,243), indexmask (S,B,243) int.  Returns probs (S,B,243),
    readout (S,B,1)."""
    S, N, _ = x.shape
    B = len_vec.shape[1]
    A = ACTION_SPACE_LENGTH
    hid = params["w_act2"].shape[1]

    # TODO(synk): torch .nonzero()+np.pad packing is data-dependent; replicated
    # deterministically as a static packing table composed with the runtime
    # indexmask.  This tiny (S, B, 243) int32 gather on *inputs* is the only
    # work outside the fused kernel.
    pack_src = jnp.asarray(_pack_source_table(batch_num_nodes, N))           # (B, A)
    sel_idx = jnp.take_along_axis(
        jnp.broadcast_to(pack_src[None], (S, B, A)),
        indexmask.astype(jnp.int32), axis=2)

    sel_i_np, sel_j_np = _pair_selector_tables(N)
    sel_i = jnp.asarray(sel_i_np)
    sel_j = jnp.asarray(sel_j_np)

    # Repack action_2 weight: a single (hid, 2*hid) matmul feeds both U and V.
    w2p = jnp.concatenate(
        [params["w_act2"][:hid, :], params["w_act2"][hid:, :]], axis=1)

    w_list = [params["w_gcn"], params["b_gcn"],
              params["w_fcv1"], params["b_fcv1"],
              params["w_fcv2"], params["b_fcv2"],
              w2p, params["b_act2"],
              params["w_final"], params["b_final"]]

    def inst_spec(*tail):                       # one instance block per grid step
        zeros = (0,) * len(tail)
        return pl.BlockSpec((1,) + tail, lambda s, _z=zeros: (s,) + _z)

    def whole_spec(arr):                        # whole-array VMEM, grid-invariant
        zeros = (0,) * arr.ndim
        return pl.BlockSpec(arr.shape, lambda s, _z=zeros: _z)

    in_specs = ([inst_spec(N, x.shape[2]),      # x
                 inst_spec(N, N),               # a_hat
                 inst_spec(B, N),               # len_vec
                 inst_spec(B, A),               # mask
                 inst_spec(B, A),               # sel_idx (int32)
                 whole_spec(sel_i),             # static pair selectors
                 whole_spec(sel_j)]
                + [whole_spec(w) for w in w_list])

    probs, readout = pl.pallas_call(
        fused_forward_kernel,
        grid=(S,),
        in_specs=in_specs,
        out_specs=(inst_spec(B, A), inst_spec(B, 1)),
        out_shape=(jax.ShapeDtypeStruct((S, B, A), jnp.float32),
                   jax.ShapeDtypeStruct((S, B, 1), jnp.float32)),
        compiler_params=pltpu.CompilerParams(
            dimension_semantics=("parallel",)),   # both TensorCores on v7x
    )(x, a_hat, len_vec, mask, sel_idx, sel_i, sel_j, *w_list)
    return probs, readout


def forward(x, a_hat, len_vec, mask, indexmask, params, *, batch_num_nodes):
    """Single-instance convenience wrapper (matches the torch module's call)."""
    probs, readout = forward_stacked(
        x[None], a_hat[None], len_vec[None], mask[None], indexmask[None],
        params, batch_num_nodes=batch_num_nodes)
    return probs[0], readout[0]


# ----------------------------------------------------------------------------
# Pure-JAX reference (mirrors the torch module) for correctness checking
# ----------------------------------------------------------------------------
def reference_forward(x, a_hat, len_vec, mask, indexmask, params, batch_num_nodes):
    hp = functools.partial(jnp.dot, precision=lax.Precision.HIGHEST)
    h = jnp.maximum(hp(hp(a_hat, x), params["w_gcn"]) + params["b_gcn"], 0.0)
    pooled = hp(len_vec, h)
    zv = jnp.maximum(hp(pooled, params["w_fcv1"]) + params["b_fcv1"], 0.0)
    readout = hp(zv, params["w_fcv2"]) + params["b_fcv2"]

    N = x.shape[0]
    pair = jnp.concatenate(
        [jnp.repeat(h[:, None, :], N, axis=1),     # Y2[i, j] = H[i]
         jnp.repeat(h[None, :, :], N, axis=0)],    # X2[i, j] = H[j]
        axis=-1)
    z2 = jnp.maximum(
        jnp.einsum("ijk,kl->ijl", jnp.maximum(pair, 0.0), params["w_act2"],
                   precision=lax.Precision.HIGHEST) + params["b_act2"], 0.0)
    sa3 = jnp.einsum("ijk,kl->ijl", z2, params["w_final"],
                     precision=lax.Precision.HIGHEST) + params["b_final"]
    lm = hp(len_vec.T, len_vec)
    sa3 = sa3 * lm[:, :, None]

    rows = []
    off = 0
    for g, n in enumerate(batch_num_nodes):
        blk = sa3[off:off + n, off:off + n, :].reshape(-1)
        row = jnp.zeros((ACTION_SPACE_LENGTH,), jnp.float32).at[: n * n * BOND_TYPES].set(blk)
        rows.append(jnp.take(row, indexmask[g], axis=0))
        off += n
    logits = jnp.stack(rows) + mask
    return jax.nn.softmax(logits, axis=-1), readout


# ----------------------------------------------------------------------------
# Main
# ----------------------------------------------------------------------------
if __name__ == "__main__":
    node_dim = hid_dim = 32
    batch_num_nodes = (5, 4)
    N = sum(batch_num_nodes)
    B = len(batch_num_nodes)
    S = 2   # stacked molecule-batch instances -> leading "parallel" grid axis

    key = jax.random.PRNGKey(0)
    ks = jax.random.split(key, 16)

    def init(k, shape, scale):
        return scale * jax.random.normal(k, shape, jnp.float32)

    params = {
        "w_gcn": init(ks[0], (node_dim, hid_dim), 0.2),
        "b_gcn": init(ks[1], (1, hid_dim), 0.2),
        "w_fcv1": init(ks[2], (node_dim, node_dim // 2), 0.2),
        "b_fcv1": init(ks[3], (1, node_dim // 2), 0.2),
        "w_fcv2": init(ks[4], (node_dim // 2, 1), 0.2),
        "b_fcv2": init(ks[5], (1, 1), 0.2),
        "w_act2": init(ks[6], (2 * hid_dim, hid_dim), 0.2),
        "b_act2": init(ks[7], (1, hid_dim), 0.2),
        "w_final": init(ks[8], (hid_dim, BOND_TYPES), 0.2),
        "b_final": init(ks[9], (1, BOND_TYPES), 0.2),
    }

    # per-instance node features
    x = init(ks[10], (S, N, node_dim), 1.0)

    # shared block-diagonal chain adjacency with self loops, symmetric normalized
    adj = np.zeros((N, N), np.float32)
    off = 0
    for n in batch_num_nodes:
        for i in range(n):
            adj[off + i, off + i] = 1.0
            if i + 1 < n:
                adj[off + i, off + i + 1] = 1.0
                adj[off + i + 1, off + i] = 1.0
        off += n
    dinv = 1.0 / np.sqrt(adj.sum(axis=1))
    a_hat_1 = jnp.asarray(adj * dinv[:, None] * dinv[None, :])
    a_hat = jnp.stack([a_hat_1] * S)

    # len_vec: (B, N) graph-membership indicator (also the sum-pooling matrix)
    lv = np.zeros((B, N), np.float32)
    off = 0
    for g, n in enumerate(batch_num_nodes):
        lv[g, off:off + n] = 1.0
        off += n
    len_vec_1 = jnp.asarray(lv)
    len_vec = jnp.stack([len_vec_1] * S)

    # per-instance indexmask: deterministic per-graph permutations of the action space
    def make_indexmask(k):
        return jnp.stack([jax.random.permutation(kk, ACTION_SPACE_LENGTH)
                          for kk in jax.random.split(k, B)]).astype(jnp.int32)

    indexmask = jnp.stack([make_indexmask(k) for k in jax.random.split(ks[11], S)])

    # additive mask: 0 where the permuted index points at a real (intra-graph) action
    valid = jnp.asarray([n * n * BOND_TYPES for n in batch_num_nodes], jnp.int32)
    mask = jnp.where(indexmask < valid[None, :, None], 0.0, -1e9).astype(jnp.float32)

    fwd = jax.jit(functools.partial(forward_stacked, batch_num_nodes=batch_num_nodes))
    probs, readout = fwd(x, a_hat, len_vec, mask, indexmask, params)
    jax.block_until_ready((probs, readout))

    assert probs.shape == (S, B, ACTION_SPACE_LENGTH)
    assert readout.shape == (S, B, 1)

    for s in range(S):
        ref_probs, ref_readout = reference_forward(
            x[s], a_hat_1, len_vec_1, mask[s], indexmask[s], params, batch_num_nodes)
        assert jnp.allclose(probs[s], ref_probs, rtol=3e-2, atol=1e-5), \
            float(jnp.max(jnp.abs(probs[s] - ref_probs)))
        assert jnp.allclose(readout[s], ref_readout, rtol=3e-2, atol=1e-4), \
            float(jnp.max(jnp.abs(readout[s] - ref_readout)))
    assert jnp.allclose(jnp.sum(probs, axis=-1), 1.0, atol=1e-4)

    print("KERNEL_OK")
</pallas_src>

<mosaic_0001>
module attributes {stable_mosaic.version = 11 : i64} {
  func.func @fused_forward_kernel(%arg0: i32, %arg1: memref<1x9x32xf32, #tpu.memory_space<vmem>>, %arg2: memref<1x9x9xf32, #tpu.memory_space<vmem>>, %arg3: memref<1x2x9xf32, #tpu.memory_space<vmem>>, %arg4: memref<1x2x243xf32, #tpu.memory_space<vmem>>, %arg5: memref<1x2x243xi32, #tpu.memory_space<vmem>>, %arg6: memref<81x9xf32, #tpu.memory_space<vmem>>, %arg7: memref<81x9xf32, #tpu.memory_space<vmem>>, %arg8: memref<32x32xf32, #tpu.memory_space<vmem>>, %arg9: memref<1x32xf32, #tpu.memory_space<vmem>>, %arg10: memref<32x16xf32, #tpu.memory_space<vmem>>, %arg11: memref<1x16xf32, #tpu.memory_space<vmem>>, %arg12: memref<16x1xf32, #tpu.memory_space<vmem>>, %arg13: memref<1x1xf32, #tpu.memory_space<vmem>>, %arg14: memref<32x64xf32, #tpu.memory_space<vmem>>, %arg15: memref<1x32xf32, #tpu.memory_space<vmem>>, %arg16: memref<32x3xf32, #tpu.memory_space<vmem>>, %arg17: memref<1x3xf32, #tpu.memory_space<vmem>>, %arg18: memref<1x2x243xf32, #tpu.memory_space<vmem>>, %arg19: memref<1x2x1xf32, #tpu.memory_space<vmem>>) attributes {dimension_semantics = [#tpu.dimension_semantics<parallel>], iteration_bounds = array<i64: 2>, scalar_prefetch = 0 : i64, scratch_operands = 0 : i64, tpu.core_type = #tpu.core_type<tc>, window_params = [{transform_indices = @transform_0, window_bounds = array<i64: 1, 9, 32>}, {transform_indices = @transform_1, window_bounds = array<i64: 1, 9, 9>}, {transform_indices = @transform_2, window_bounds = array<i64: 1, 2, 9>}, {transform_indices = @transform_3, window_bounds = array<i64: 1, 2, 243>}, {transform_indices = @transform_4, window_bounds = array<i64: 1, 2, 243>}, {pipeline_mode = #tpu.pipeline_mode<synchronous>, transform_indices = @transform_5, window_bounds = array<i64: 81, 9>}, {pipeline_mode = #tpu.pipeline_mode<synchronous>, transform_indices = @transform_6, window_bounds = array<i64: 81, 9>}, {pipeline_mode = #tpu.pipeline_mode<synchronous>, transform_indices = @transform_7, window_bounds = array<i64: 32, 32>}, {pipeline_mode = #tpu.pipeline_mode<synchronous>, transform_indices = @transform_8, window_bounds = array<i64: 1, 32>}, {pipeline_mode = #tpu.pipeline_mode<synchronous>, transform_indices = @transform_9, window_bounds = array<i64: 32, 16>}, {pipeline_mode = #tpu.pipeline_mode<synchronous>, transform_indices = @transform_10, window_bounds = array<i64: 1, 16>}, {pipeline_mode = #tpu.pipeline_mode<synchronous>, transform_indices = @transform_11, window_bounds = array<i64: 16, 1>}, {pipeline_mode = #tpu.pipeline_mode<synchronous>, transform_indices = @transform_12, window_bounds = array<i64: 1, 1>}, {pipeline_mode = #tpu.pipeline_mode<synchronous>, transform_indices = @transform_13, window_bounds = array<i64: 32, 64>}, {pipeline_mode = #tpu.pipeline_mode<synchronous>, transform_indices = @transform_14, window_bounds = array<i64: 1, 32>}, {pipeline_mode = #tpu.pipeline_mode<synchronous>, transform_indices = @transform_15, window_bounds = array<i64: 32, 3>}, {pipeline_mode = #tpu.pipeline_mode<synchronous>, transform_indices = @transform_16, window_bounds = array<i64: 1, 3>}, {transform_indices = @transform_17, window_bounds = array<i64: 1, 2, 243>}, {transform_indices = @transform_18, window_bounds = array<i64: 1, 2, 1>}]} {
    %c0 = arith.constant 0 : index
    %c0_0 = arith.constant 0 : index
    %c0_1 = arith.constant 0 : index
    %0 = vector.load %arg1[%c0, %c0_0, %c0_1] : memref<1x9x32xf32, #tpu.memory_space<vmem>>, vector<1x9x32xf32>
    %1 = vector.shape_cast %0 : vector<1x9x32xf32> to vector<9x32xf32>
    %c0_2 = arith.constant 0 : index
    %c0_3 = arith.constant 0 : index
    %c0_4 = arith.constant 0 : index
    %2 = vector.load %arg2[%c0_2, %c0_3, %c0_4] : memref<1x9x9xf32, #tpu.memory_space<vmem>>, vector<1x9x9xf32>
    %3 = vector.shape_cast %2 : vector<1x9x9xf32> to vector<9x9xf32>
    %c0_5 = arith.constant 0 : index
    %c0_6 = arith.constant 0 : index
    %c0_7 = arith.constant 0 : index
    %4 = vector.load %arg3[%c0_5, %c0_6, %c0_7] : memref<1x2x9xf32, #tpu.memory_space<vmem>>, vector<1x2x9xf32>
    %5 = vector.shape_cast %4 : vector<1x2x9xf32> to vector<2x9xf32>
    %c0_8 = arith.constant 0 : index
    %c0_9 = arith.constant 0 : index
    %c0_10 = arith.constant 0 : index
    %6 = vector.load %arg4[%c0_8, %c0_9, %c0_10] : memref<1x2x243xf32, #tpu.memory_space<vmem>>, vector<1x2x243xf32>
    %7 = vector.shape_cast %6 : vector<1x2x243xf32> to vector<2x243xf32>
    %c0_11 = arith.constant 0 : index
    %c0_12 = arith.constant 0 : index
    %c0_13 = arith.constant 0 : index
    %8 = vector.load %arg5[%c0_11, %c0_12, %c0_13] : memref<1x2x243xi32, #tpu.memory_space<vmem>>, vector<1x2x243xi32>
    %9 = vector.shape_cast %8 : vector<1x2x243xi32> to vector<2x243xi32>
    %cst = arith.constant dense<0.000000e+00> : vector<9x32xf32>
    %10 = tpu.matmul %3, %1, %cst {dimension_numbers = #tpu.dot_dimension_numbers<[1], [0], [0], [1], [0, 0, 1, 1], [], []>} : vector<9x9xf32>, vector<9x32xf32>, vector<9x32xf32> -> vector<9x32xf32>
    %c0_14 = arith.constant 0 : index
    %c0_15 = arith.constant 0 : index
    %11 = vector.load %arg8[%c0_14, %c0_15] : memref<32x32xf32, #tpu.memory_space<vmem>>, vector<32x32xf32>
    %cst_16 = arith.constant dense<0.000000e+00> : vector<9x32xf32>
    %12 = tpu.matmul %10, %11, %cst_16 {dimension_numbers = #tpu.dot_dimension_numbers<[1], [0], [0], [1], [0, 0, 1, 1], [], []>} : vector<9x32xf32>, vector<32x32xf32>, vector<9x32xf32> -> vector<9x32xf32>
    %c0_17 = arith.constant 0 : index
    %c0_18 = arith.constant 0 : index
    %13 = vector.load %arg9[%c0_17, %c0_18] : memref<1x32xf32, #tpu.memory_space<vmem>>, vector<1x32xf32>
    %14 = vector.broadcast %13 : vector<1x32xf32> to vector<9x32xf32>
    %15 = arith.addf %12, %14 : vector<9x32xf32>
    %cst_19 = arith.constant 0.000000e+00 : f32
    %16 = vector.broadcast %cst_19 : f32 to vector<9x32xf32>
    %17 = arith.maximumf %15, %16 : vector<9x32xf32>
    %cst_20 = arith.constant dense<0.000000e+00> : vector<2x32xf32>
    %18 = tpu.matmul %5, %17, %cst_20 {dimension_numbers = #tpu.dot_dimension_numbers<[1], [0], [0], [1], [0, 0, 1, 1], [], []>} : vector<2x9xf32>, vector<9x32xf32>, vector<2x32xf32> -> vector<2x32xf32>
    %c0_21 = arith.constant 0 : index
    %c0_22 = arith.constant 0 : index
    %19 = vector.load %arg10[%c0_21, %c0_22] : memref<32x16xf32, #tpu.memory_space<vmem>>, vector<32x16xf32>
    %cst_23 = arith.constant dense<0.000000e+00> : vector<2x16xf32>
    %20 = tpu.matmul %18, %19, %cst_23 {dimension_numbers = #tpu.dot_dimension_numbers<[1], [0], [0], [1], [0, 0, 1, 1], [], []>} : vector<2x32xf32>, vector<32x16xf32>, vector<2x16xf32> -> vector<2x16xf32>
    %c0_24 = arith.constant 0 : index
    %c0_25 = arith.constant 0 : index
    %21 = vector.load %arg11[%c0_24, %c0_25] : memref<1x16xf32, #tpu.memory_space<vmem>>, vector<1x16xf32>
    %22 = vector.broadcast %21 : vector<1x16xf32> to vector<2x16xf32>
    %23 = arith.addf %20, %22 : vector<2x16xf32>
    %cst_26 = arith.constant 0.000000e+00 : f32
    %24 = vector.broadcast %cst_26 : f32 to vector<2x16xf32>
    %25 = arith.maximumf %23, %24 : vector<2x16xf32>
    %c0_27 = arith.constant 0 : index
    %c0_28 = arith.constant 0 : index
    %26 = vector.load %arg12[%c0_27, %c0_28] : memref<16x1xf32, #tpu.memory_space<vmem>>, vector<16x1xf32>
    %cst_29 = arith.constant dense<0.000000e+00> : vector<2x1xf32>
    %27 = tpu.matmul %25, %26, %cst_29 {dimension_numbers = #tpu.dot_dimension_numbers<[1], [0], [0], [1], [0, 0, 1, 1], [], []>} : vector<2x16xf32>, vector<16x1xf32>, vector<2x1xf32> -> vector<2x1xf32>
    %c0_30 = arith.constant 0 : index
    %c0_31 = arith.constant 0 : index
    %28 = vector.load %arg13[%c0_30, %c0_31] : memref<1x1xf32, #tpu.memory_space<vmem>>, vector<1x1xf32>
    %29 = vector.broadcast %28 : vector<1x1xf32> to vector<2x1xf32>
    %30 = arith.addf %27, %29 : vector<2x1xf32>
    %c0_32 = arith.constant 0 : index
    %c0_33 = arith.constant 0 : index
    %c0_34 = arith.constant 0 : index
    %31 = vector.load %arg19[%c0_32, %c0_33, %c0_34] : memref<1x2x1xf32, #tpu.memory_space<vmem>>, vector<1x2x1xf32>
    %32 = vector.shape_cast %31 : vector<1x2x1xf32> to vector<2x1xf32>
    %33 = vector.shape_cast %30 : vector<2x1xf32> to vector<1x2x1xf32>
    tpu.vector_store %arg19[%c0_32, %c0_33, %c0_34], %33 {strides = array<i32>} : memref<1x2x1xf32, #tpu.memory_space<vmem>>, vector<1x2x1xf32>,
    %c0_35 = arith.constant 0 : index
    %c0_36 = arith.constant 0 : index
    %34 = vector.load %arg14[%c0_35, %c0_36] : memref<32x64xf32, #tpu.memory_space<vmem>>, vector<32x64xf32>
    %cst_37 = arith.constant dense<0.000000e+00> : vector<9x64xf32>
    %35 = tpu.matmul %17, %34, %cst_37 {dimension_numbers = #tpu.dot_dimension_numbers<[1], [0], [0], [1], [0, 0, 1, 1], [], []>} : vector<9x32xf32>, vector<32x64xf32>, vector<9x64xf32> -> vector<9x64xf32>
    %36 = vector.extract_strided_slice %35 {offsets = [0, 0], sizes = [9, 32], strides = [1, 1]} : vector<9x64xf32> to vector<9x32xf32>
    %37 = vector.extract_strided_slice %35 {offsets = [0, 32], sizes = [9, 32], strides = [1, 1]} : vector<9x64xf32> to vector<9x32xf32>
    %c0_38 = arith.constant 0 : index
    %c0_39 = arith.constant 0 : index
    %38 = vector.load %arg6[%c0_38, %c0_39] : memref<81x9xf32, #tpu.memory_space<vmem>>, vector<81x9xf32>
    %cst_40 = arith.constant dense<0.000000e+00> : vector<81x32xf32>
    %39 = tpu.matmul %38, %36, %cst_40 {dimension_numbers = #tpu.dot_dimension_numbers<[1], [0], [0], [1], [0, 0, 1, 1], [], []>} : vector<81x9xf32>, vector<9x32xf32>, vector<81x32xf32> -> vector<81x32xf32>
    %c0_41 = arith.constant 0 : index
    %c0_42 = arith.constant 0 : index
    %40 = vector.load %arg7[%c0_41, %c0_42] : memref<81x9xf32, #tpu.memory_space<vmem>>, vector<81x9xf32>
    %cst_43 = arith.constant dense<0.000000e+00> : vector<81x32xf32>
    %41 = tpu.matmul %40, %37, %cst_43 {dimension_numbers = #tpu.dot_dimension_numbers<[1], [0], [0], [1], [0, 0, 1, 1], [], []>} : vector<81x9xf32>, vector<9x32xf32>, vector<81x32xf32> -> vector<81x32xf32>
    %42 = arith.addf %39, %41 : vector<81x32xf32>
    %c0_44 = arith.constant 0 : index
    %c0_45 = arith.constant 0 : index
    %43 = vector.load %arg15[%c0_44, %c0_45] : memref<1x32xf32, #tpu.memory_space<vmem>>, vector<1x32xf32>
    %44 = vector.broadcast %43 : vector<1x32xf32> to vector<81x32xf32>
    %45 = arith.addf %42, %44 : vector<81x32xf32>
    %cst_46 = arith.constant 0.000000e+00 : f32
    %46 = vector.broadcast %cst_46 : f32 to vector<81x32xf32>
    %47 = arith.maximumf %45, %46 : vector<81x32xf32>
    %c0_47 = arith.constant 0 : index
    %c0_48 = arith.constant 0 : index
    %48 = vector.load %arg16[%c0_47, %c0_48] : memref<32x3xf32, #tpu.memory_space<vmem>>, vector<32x3xf32>
    %cst_49 = arith.constant dense<0.000000e+00> : vector<81x3xf32>
    %49 = tpu.matmul %47, %48, %cst_49 {dimension_numbers = #tpu.dot_dimension_numbers<[1], [0], [0], [1], [0, 0, 1, 1], [], []>} : vector<81x32xf32>, vector<32x3xf32>, vector<81x3xf32> -> vector<81x3xf32>
    %c0_50 = arith.constant 0 : index
    %c0_51 = arith.constant 0 : index
    %50 = vector.load %arg17[%c0_50, %c0_51] : memref<1x3xf32, #tpu.memory_space<vmem>>, vector<1x3xf32>
    %51 = vector.broadcast %50 : vector<1x3xf32> to vector<81x3xf32>
    %52 = arith.addf %49, %51 : vector<81x3xf32>
    %53 = tpu.iota {dimensions = array<i32: 0>} : vector<81x243xi32>
    %c3_i32 = arith.constant 3 : i32
    %54 = vector.broadcast %c3_i32 : i32 to vector<81x243xi32>
    %55 = arith.muli %53, %54 : vector<81x243xi32>
    %c0_i32 = arith.constant 0 : i32
    %56 = vector.broadcast %c0_i32 : i32 to vector<81x243xi32>
    %57 = arith.addi %55, %56 : vector<81x243xi32>
    %c1_i32 = arith.constant 1 : i32
    %58 = vector.broadcast %c1_i32 : i32 to vector<81x243xi32>
    %59 = arith.addi %55, %58 : vector<81x243xi32>
    %c2_i32 = arith.constant 2 : i32
    %60 = vector.broadcast %c2_i32 : i32 to vector<81x243xi32>
    %61 = arith.addi %55, %60 : vector<81x243xi32>
    %62 = vector.extract_strided_slice %52 {offsets = [0, 0], sizes = [81, 1], strides = [1, 1]} : vector<81x3xf32> to vector<81x1xf32>
    %63 = vector.extract_strided_slice %52 {offsets = [0, 1], sizes = [81, 1], strides = [1, 1]} : vector<81x3xf32> to vector<81x1xf32>
    %64 = vector.extract_strided_slice %52 {offsets = [0, 2], sizes = [81, 1], strides = [1, 1]} : vector<81x3xf32> to vector<81x1xf32>
    %65 = tpu.iota {dimensions = array<i32: 0>} : vector<2x81xi32>
    %66 = vector.extract_strided_slice %9 {offsets = [0, 0], sizes = [1, 243], strides = [1, 1]} : vector<2x243xi32> to vector<1x243xi32>
    %67 = vector.broadcast %66 : vector<1x243xi32> to vector<81x243xi32>
    %68 = arith.cmpi eq, %67, %57 : vector<81x243xi32>
    %69 = arith.extui %68 : vector<81x243xi1> to vector<81x243xi32>
    %70 = arith.sitofp %69 : vector<81x243xi32> to vector<81x243xf32>
    %71 = vector.broadcast %62 : vector<81x1xf32> to vector<81x243xf32>
    %72 = arith.mulf %70, %71 : vector<81x243xf32>
    %73 = vector.broadcast %66 : vector<1x243xi32> to vector<81x243xi32>
    %74 = arith.cmpi eq, %73, %59 : vector<81x243xi32>
    %75 = arith.extui %74 : vector<81x243xi1> to vector<81x243xi32>
    %76 = arith.sitofp %75 : vector<81x243xi32> to vector<81x243xf32>
    %77 = vector.broadcast %63 : vector<81x1xf32> to vector<81x243xf32>
    %78 = arith.mulf %76, %77 : vector<81x243xf32>
    %79 = arith.addf %72, %78 : vector<81x243xf32>
    %80 = vector.broadcast %66 : vector<1x243xi32> to vector<81x243xi32>
    %81 = arith.cmpi eq, %80, %61 : vector<81x243xi32>
    %82 = arith.extui %81 : vector<81x243xi1> to vector<81x243xi32>
    %83 = arith.sitofp %82 : vector<81x243xi32> to vector<81x243xf32>
    %84 = vector.broadcast %64 : vector<81x1xf32> to vector<81x243xf32>
    %85 = arith.mulf %83, %84 : vector<81x243xf32>
    %86 = arith.addf %79, %85 : vector<81x243xf32>
    %c0_i32_52 = arith.constant 0 : i32
    %87 = vector.broadcast %c0_i32_52 : i32 to vector<2x81xi32>
    %88 = arith.cmpi eq, %65, %87 : vector<2x81xi32>
    %89 = arith.extui %88 : vector<2x81xi1> to vector<2x81xi32>
    %90 = arith.sitofp %89 : vector<2x81xi32> to vector<2x81xf32>
    %cst_53 = arith.constant dense<0.000000e+00> : vector<2x243xf32>
    %91 = tpu.matmul %90, %86, %cst_53 {dimension_numbers = #tpu.dot_dimension_numbers<[1], [0], [0], [1], [0, 0, 1, 1], [], []>} : vector<2x81xf32>, vector<81x243xf32>, vector<2x243xf32> -> vector<2x243xf32>
    %92 = arith.addf %7, %91 : vector<2x243xf32>
    %93 = vector.extract_strided_slice %9 {offsets = [1, 0], sizes = [1, 243], strides = [1, 1]} : vector<2x243xi32> to vector<1x243xi32>
    %94 = vector.broadcast %93 : vector<1x243xi32> to vector<81x243xi32>
    %95 = arith.cmpi eq, %94, %57 : vector<81x243xi32>
    %96 = arith.extui %95 : vector<81x243xi1> to vector<81x243xi32>
    %97 = arith.sitofp %96 : vector<81x243xi32> to vector<81x243xf32>
    %98 = vector.broadcast %62 : vector<81x1xf32> to vector<81x243xf32>
    %99 = arith.mulf %97, %98 : vector<81x243xf32>
    %100 = vector.broadcast %93 : vector<1x243xi32> to vector<81x243xi32>
    %101 = arith.cmpi eq, %100, %59 : vector<81x243xi32>
    %102 = arith.extui %101 : vector<81x243xi1> to vector<81x243xi32>
    %103 = arith.sitofp %102 : vector<81x243xi32> to vector<81x243xf32>
    %104 = vector.broadcast %63 : vector<81x1xf32> to vector<81x243xf32>
    %105 = arith.mulf %103, %104 : vector<81x243xf32>
    %106 = arith.addf %99, %105 : vector<81x243xf32>
    %107 = vector.broadcast %93 : vector<1x243xi32> to vector<81x243xi32>
    %108 = arith.cmpi eq, %107, %61 : vector<81x243xi32>
    %109 = arith.extui %108 : vector<81x243xi1> to vector<81x243xi32>
    %110 = arith.sitofp %109 : vector<81x243xi32> to vector<81x243xf32>
    %111 = vector.broadcast %64 : vector<81x1xf32> to vector<81x243xf32>
    %112 = arith.mulf %110, %111 : vector<81x243xf32>
    %113 = arith.addf %106, %112 : vector<81x243xf32>
    %c1_i32_54 = arith.constant 1 : i32
    %114 = vector.broadcast %c1_i32_54 : i32 to vector<2x81xi32>
    %115 = arith.cmpi eq, %65, %114 : vector<2x81xi32>
    %116 = arith.extui %115 : vector<2x81xi1> to vector<2x81xi32>
    %117 = arith.sitofp %116 : vector<2x81xi32> to vector<2x81xf32>
    %cst_55 = arith.constant dense<0.000000e+00> : vector<2x243xf32>
    %118 = tpu.matmul %117, %113, %cst_55 {dimension_numbers = #tpu.dot_dimension_numbers<[1], [0], [0], [1], [0, 0, 1, 1], [], []>} : vector<2x81xf32>, vector<81x243xf32>, vector<2x243xf32> -> vector<2x243xf32>
    %119 = arith.addf %92, %118 : vector<2x243xf32>
    %cst_56 = arith.constant dense<0xFF800000> : vector<2xf32>
    %120 = vector.multi_reduction <maximumf>, %119, %cst_56 [1] : vector<2x243xf32> to vector<2xf32>
    %121 = vector.shape_cast %120 : vector<2xf32> to vector<2x1xf32>
    %122 = vector.broadcast %121 : vector<2x1xf32> to vector<2x243xf32>
    %123 = arith.subf %119, %122 : vector<2x243xf32>
    %124 = math.exp %123 : vector<2x243xf32>
    %cst_57 = arith.constant dense<0.000000e+00> : vector<2xf32>
    %125 = vector.multi_reduction <add>, %124, %cst_57 [1] : vector<2x243xf32> to vector<2xf32>
    %126 = vector.shape_cast %125 : vector<2xf32> to vector<2x1xf32>
    %127 = vector.broadcast %126 : vector<2x1xf32> to vector<2x243xf32>
    %128 = arith.divf %124, %127 : vector<2x243xf32>
    %c0_58 = arith.constant 0 : index
    %c0_59 = arith.constant 0 : index
    %c0_60 = arith.constant 0 : index
    %129 = vector.load %arg18[%c0_58, %c0_59, %c0_60] : memref<1x2x243xf32, #tpu.memory_space<vmem>>, vector<1x2x243xf32>
    %130 = vector.shape_cast %129 : vector<1x2x243xf32> to vector<2x243xf32>
    %131 = vector.shape_cast %128 : vector<2x243xf32> to vector<1x2x243xf32>
    tpu.vector_store %arg18[%c0_58, %c0_59, %c0_60], %131 {strides = array<i32>} : memref<1x2x243xf32, #tpu.memory_space<vmem>>, vector<1x2x243xf32>,
    return
  }
  func.func @transform_0(%arg0: i32) -> (i32, i32, i32) {
    %c0_i32 = arith.constant 0 : i32
    %c0_i32_0 = arith.constant 0 : i32
    %c0_i32_1 = arith.constant 0 : i32
    return %arg0, %c0_i32, %c0_i32_0 : i32, i32, i32
  }
  func.func @transform_1(%arg0: i32) -> (i32, i32, i32) {
    %c0_i32 = arith.constant 0 : i32
    %c0_i32_0 = arith.constant 0 : i32
    %c0_i32_1 = arith.constant 0 : i32
    return %arg0, %c0_i32, %c0_i32_0 : i32, i32, i32
  }
  func.func @transform_2(%arg0: i32) -> (i32, i32, i32) {
    %c0_i32 = arith.constant 0 : i32
    %c0_i32_0 = arith.constant 0 : i32
    %c0_i32_1 = arith.constant 0 : i32
    return %arg0, %c0_i32, %c0_i32_0 : i32, i32, i32
  }
  func.func @transform_3(%arg0: i32) -> (i32, i32, i32) {
    %c0_i32 = arith.constant 0 : i32
    %c0_i32_0 = arith.constant 0 : i32
    %c0_i32_1 = arith.constant 0 : i32
    return %arg0, %c0_i32, %c0_i32_0 : i32, i32, i32
  }
  func.func @transform_4(%arg0: i32) -> (i32, i32, i32) {
    %c0_i32 = arith.constant 0 : i32
    %c0_i32_0 = arith.constant 0 : i32
    %c0_i32_1 = arith.constant 0 : i32
    return %arg0, %c0_i32, %c0_i32_0 : i32, i32, i32
  }
  func.func @transform_5(%arg0: i32) -> (i32, i32) {
    %c0_i32 = arith.constant 0 : i32
    %c0_i32_0 = arith.constant 0 : i32
    %c0_i32_1 = arith.constant 0 : i32
    return %c0_i32, %c0_i32_0 : i32, i32
  }
  func.func @transform_6(%arg0: i32) -> (i32, i32) {
    %c0_i32 = arith.constant 0 : i32
    %c0_i32_0 = arith.constant 0 : i32
    %c0_i32_1 = arith.constant 0 : i32
    return %c0_i32, %c0_i32_0 : i32, i32
  }
  func.func @transform_7(%arg0: i32) -> (i32, i32) {
    %c0_i32 = arith.constant 0 : i32
    %c0_i32_0 = arith.constant 0 : i32
    %c0_i32_1 = arith.constant 0 : i32
    return %c0_i32, %c0_i32_0 : i32, i32
  }
  func.func @transform_8(%arg0: i32) -> (i32, i32) {
    %c0_i32 = arith.constant 0 : i32
    %c0_i32_0 = arith.constant 0 : i32
    %c0_i32_1 = arith.constant 0 : i32
    return %c0_i32, %c0_i32_0 : i32, i32
  }
  func.func @transform_9(%arg0: i32) -> (i32, i32) {
    %c0_i32 = arith.constant 0 : i32
    %c0_i32_0 = arith.constant 0 : i32
    %c0_i32_1 = arith.constant 0 : i32
    return %c0_i32, %c0_i32_0 : i32, i32
  }
  func.func @transform_10(%arg0: i32) -> (i32, i32) {
    %c0_i32 = arith.constant 0 : i32
    %c0_i32_0 = arith.constant 0 : i32
    %c0_i32_1 = arith.constant 0 : i32
    return %c0_i32, %c0_i32_0 : i32, i32
  }
  func.func @transform_11(%arg0: i32) -> (i32, i32) {
    %c0_i32 = arith.constant 0 : i32
    %c0_i32_0 = arith.constant 0 : i32
    %c0_i32_1 = arith.constant 0 : i32
    return %c0_i32, %c0_i32_0 : i32, i32
  }
  func.func @transform_12(%arg0: i32) -> (i32, i32) {
    %c0_i32 = arith.constant 0 : i32
    %c0_i32_0 = arith.constant 0 : i32
    %c0_i32_1 = arith.constant 0 : i32
    return %c0_i32, %c0_i32_0 : i32, i32
  }
  func.func @transform_13(%arg0: i32) -> (i32, i32) {
    %c0_i32 = arith.constant 0 : i32
    %c0_i32_0 = arith.constant 0 : i32
    %c0_i32_1 = arith.constant 0 : i32
    return %c0_i32, %c0_i32_0 : i32, i32
  }
  func.func @transform_14(%arg0: i32) -> (i32, i32) {
    %c0_i32 = arith.constant 0 : i32
    %c0_i32_0 = arith.constant 0 : i32
    %c0_i32_1 = arith.constant 0 : i32
    return %c0_i32, %c0_i32_0 : i32, i32
  }
  func.func @transform_15(%arg0: i32) -> (i32, i32) {
    %c0_i32 = arith.constant 0 : i32
    %c0_i32_0 = arith.constant 0 : i32
    %c0_i32_1 = arith.constant 0 : i32
    return %c0_i32, %c0_i32_0 : i32, i32
  }
  func.func @transform_16(%arg0: i32) -> (i32, i32) {
    %c0_i32 = arith.constant 0 : i32
    %c0_i32_0 = arith.constant 0 : i32
    %c0_i32_1 = arith.constant 0 : i32
    return %c0_i32, %c0_i32_0 : i32, i32
  }
  func.func @transform_17(%arg0: i32) -> (i32, i32, i32) {
    %c0_i32 = arith.constant 0 : i32
    %c0_i32_0 = arith.constant 0 : i32
    %c0_i32_1 = arith.constant 0 : i32
    return %arg0, %c0_i32, %c0_i32_0 : i32, i32, i32
  }
  func.func @transform_18(%arg0: i32) -> (i32, i32, i32) {
    %c0_i32 = arith.constant 0 : i32
    %c0_i32_0 = arith.constant 0 : i32
    %c0_i32_1 = arith.constant 0 : i32
    return %arg0, %c0_i32, %c0_i32_0 : i32, i32, i32
  }
}

</mosaic_0001>

<bundles_post_ra>
// kernel: forward_stacked.1
= control target key start
LH: loop header
LB: loop body
LE: loop exit
PB: predicated region body
PF: predicated region fallthrough
CT: control target
= control target key end

     0   :  { %s4355_s0 = inlined_call_operand.vmem [shape: f32[2,9,32], index: 0, kind: input, shape index: {}]   ;;  %s4356_s1 = inlined_call_operand.vmem [shape: f32[2,9,9], index: 1, kind: input, shape index: {}]   ;;  %s4357_s2 = inlined_call_operand.vmem [shape: f32[2,2,9], index: 2, kind: input, shape index: {}]   ;;  %s4358_s3 = inlined_call_operand.vmem [shape: f32[2,2,243], index: 3, kind: input, shape index: {}]   ;;  %s4359_s4 = inlined_call_operand.vmem [shape: s32[2,2,243], index: 4, kind: input, shape index: {}]   ;;  %s4360_s5 = inlined_call_operand.vmem [shape: f32[81,9], index: 5, kind: input, shape index: {}]   ;;  %s4361_s6 = inlined_call_operand.vmem [shape: f32[81,9], index: 6, kind: input, shape index: {}]   ;;  %s4362_s7 = inlined_call_operand.vmem [shape: f32[32,32], index: 7, kind: input, shape index: {}]   ;;  %s4363_s8 = inlined_call_operand.vmem [shape: f32[1,32], index: 8, kind: input, shape index: {}]   ;;  %s4364_s9 = inlined_call_operand.vmem [shape: f32[32,16], index: 9, kind: input, shape index: {}]   ;;  %s4365_s10 = inlined_call_operand.vmem [shape: f32[1,16], index: 10, kind: input, shape index: {}]   ;;  %s4366_s11 = inlined_call_operand.vmem [shape: f32[16,1], index: 11, kind: input, shape index: {}]   ;;  %s4367_s12 = inlined_call_operand.<no memory space> [shape: f32[1,1], index: 12, kind: input, shape index: {}]   ;;  %s4368_s13 = inlined_call_operand.vmem [shape: f32[32,64], index: 13, kind: input, shape index: {}]   ;;  %s4369_s14 = inlined_call_operand.vmem [shape: f32[1,32], index: 14, kind: input, shape index: {}]   ;;  %s4370_s15 = inlined_call_operand.vmem [shape: f32[32,3], index: 15, kind: input, shape index: {}]   ;;  %s4371_s16 = inlined_call_operand.vmem [shape: f32[1,3], index: 16, kind: input, shape index: {}]   ;;  %s4372_s17 = inlined_call_operand.hbm [shape: f32[2,2,243], index: 17, kind: output, shape index: {0}]   ;;  %s4373_s18 = inlined_call_operand.vmem [shape: f32[2,2,1], index: 18, kind: output, shape index: {1}]  }
   0x1   :  { %4407 = sst [smem:[#allocation70_spill]] %s4355_s0  ;;  %v24_v0 = vstv %s4367_s12 }
   0x2   :  { %4408 = sst [smem:[#allocation71_spill]] %s4356_s1  ;;  %25 = vst [vmem:[#allocation2] sm:$0x1] %v24_v0 }
   0x3   :  { %4409 = sst [smem:[#allocation72_spill]] %s4357_s2 }
   0x4   :  { %26 = vsyncpa [#allocation4], 0 }
   0x5   :  { %28 = vsyncpa [#allocation4 + $0x1], 0  ;;  %s2787_s29 = smov 0   ;;  %s2789_s30 = smov 0  }
   0x6   :  { %s2791_s0 = smov 0   ;;  %s2793_s19 = smov 0  }
   0x7 LB: > { %4410 = sst [smem:[#allocation6_spill]] %s2669_s29  ;;  %s2808_s12 = sadd.s32 4294967295, %s2681_s19   ;;  %s2681_s19 = sphi %s2793_s19, %s4572_s19   ;;  %s2677_s0 = sphi %s2791_s0, %s4574_s0   ;;  %s2673_s30 = sphi %s2789_s30, %s4576_s30   ;;  %s2669_s29 = sphi %s2787_s29, %s4575_s29  }
   0x8   : > { %4411 = sst [smem:[#allocation7_spill]] %s2677_s0  ;;  %s2324_s1 = sadd.s32 4294967294, %s2681_s19  }
   0x9   : > { %s2812_s20 = sadd.s32 1, %s2681_s19   ;;  %s423_s21 = sadd.s32 1, %s2677_s0 }
   0xa   : > { %4412 = sst [smem:[#allocation8_spill]] %s2812_s20  ;;  %s420_s22 = ssub.s32 %s2681_s19, %s2812_s20 }
   0xb   : > { %p433_p0 = scmp.ne.s32.totalorder %s2677_s0, %s2673_s30  ;;  %p421_p1 = scmp.eq.s32.totalorder %s420_s22, 0 }
   0xc   : > { %p434_p2 = scmp.eq.s32.totalorder %s2808_s12, 1  ;;  %p439_p3 = scmp.ne.s32.totalorder %s2673_s30, %s2669_s29 }
   0xd   : > { %p440_p4 = scmp.eq.s32.totalorder %s2324_s1, 1  ;;  %p2327_p7 = scmp.ge.s32.totalorder %s2681_s19, 1 }
   0xe   : > { %s2823_s2 = scalar_select %p421_p1, %s2677_s0, %s423_s21  }
   0xf   : > { %p2825_p5 = por %p434_p2, %p433_p0  ;;  %p2829_p6 = por %p440_p4, %p439_p3 }
  0x10   : > { %4413 = sst [smem:[#allocation9_spill]] %s2823_s2  ;;  %p559_p8 = scmp.lt.s32.totalorder %s2681_s19, 3 }
  0x11   : > { %s4415_s24 = scalar_select %p2829_p6, 1, 0 }
  0x12   : > { %p560_p9 = pnand %p2327_p7, %p559_p8 }
  0x13   : > { %4416 = sst [smem:[#allocation10_spill]] %s4415_s24 }
  0x14   : > { %563 = sbr.rel (%p560_p9) target bundleno = 1718 (0x6b6), region = 88 }
  0x19   : > { %p636_p10 = scmp.lt.s32.totalorder %s2808_s12, 1  ;;  %v708_v1 = vld [vmem:[%s4362_s7 + $0x18] sm:$0xff]  ;;  %v707_v2 = vld [vmem:[%s4362_s7 + $0x10] sm:$0xff]  ;;  %v706_v3 = vld [vmem:[%s4362_s7 + $0x8] sm:$0xff]  ;;  %vm4383_vm0 = vcmask 1040384   ;;  %s4417_s24 = sld [smem:[#allocation70_spill]] }
  0x1a   : > { %732 = vmatpush.msra.mxu1 %v708_v1  ;;  %s4418_s28 = sld [smem:[#allocation71_spill]]  ;;  %vm671_vm1 = vcmask 72704   ;;  %v705_v8 = vld [vmem:[%s4362_s7] sm:$0xff]  ;;  %vm713_vm2 = vcmask 261120   ;;  %v774_v11 = vld [vmem:[%s4364_s9 + $0x18] sm:$0xff]  ;;  %v773_v12 = vld [vmem:[%s4364_s9 + $0x10] sm:$0xff] }
  0x1b   : > { %s2843_s1 = scalar_select %p636_p10, %s2808_s12, 1  ;;  %794 = vmatpush.msra.mxu3 %v774_v11  ;;  %v772_v13 = vld [vmem:[%s4364_s9 + $0x8] sm:$0xff]  ;;  %v2610_v15 = vld [vmem:[%s4363_s8] ss:$0 sm:$0xff]  ;;  %v838_v23 = vld [vmem:[%s4368_s13 + $0x18] sm:$0xff]  ;;  %vm809_vm3 = vcmask 130048  }
  0x1c   : > { %733 = vmatpush.msra.mxu1 %v707_v2  ;;  %s4419_s20 = sld [smem:[#allocation72_spill]]  ;;  %v771_v22 = vld [vmem:[%s4364_s9] sm:$0xff]  ;;  %v837_v24 = vld [vmem:[%s4368_s13 + $0x10] sm:$0xff]  ;;  %v836_v25 = vld [vmem:[%s4368_s13 + $0x8] sm:$0xff]  ;;  %s2683_s21 = smov 96   ;;  %vm833_vm4 = vcmask 1024  }
  0x1d   : > { %s2532_s2 = sshll.u32 %s2843_s1, 4  ;;  %795 = vmatpush.msra.mxu3 %v773_v12  ;;  %v835_v26 = vld [vmem:[%s4368_s13] sm:$0xff]  ;;  %v804_v28 = vld [vmem:[%s4366_s11 + $0x8] sm:$0xff]  ;;  %v869_v38 = vld [vmem:[%s4360_s5 + $0x10] sm:$0xff]  ;;  %s2534_s22 = sshll.u32 %s2843_s1, 2 }
  0x1e   : > { %734 = vmatpush.msra.mxu1 %v706_v3  ;;  %v803_v29 = vld [vmem:[%s4366_s11] sm:$0xff]  ;;  %v868_v37 = vld [vmem:[%s4360_s5 + $0x8] sm:$0xff]  ;;  %v870_v39 = vld [vmem:[%s4360_s5 + $0x18] sm:$0xff]  ;;  %s654_s0 = scalar_lea.vmem %s4358_s3, %s2534_s22 }
  0x1f   : > { %s640_s25 = scalar_lea.vmem %s4417_s24, %s2532_s2  ;;  %796 = vmatpush.msra.mxu3 %v772_v13  ;;  %v2611_v30 = vld [vmem:[%s4365_s10] ss:$0 sm:$0xff]  ;;  %v2612_v41 = vld [vmem:[#allocation2] ss:$0 sm:$0xff]  ;;  %v873_v49 = vld [vmem:[%s4360_s5 + $0x30] sm:$0xff] }
  0x20   : > { %v665_v4 = vld [vmem:[%s640_s25 + $0x8] sm:$0x1]  ;;  %v664_v5 = vld [vmem:[%s640_s25] sm:$0xff]  ;;  %s645_s29 = scalar_lea.vmem %s4418_s28, %s2532_s2  ;;  %735 = vmatpush.msra.mxu1 %v705_v8  ;;  %s2333_s28 = sshll.u32 %s2843_s1, 1  ;;  %v880_v50 = vld [vmem:[%s4361_s6 + $0x10] sm:$0xff] }
  0x21   : > { %2339 = vmatpush.msk.msra.mxu0 %vm4383_vm0, %v665_v4  ;;  %v666_v6 = vld [vmem:[%s645_s29] sm:$0xff]  ;;  %v667_v7 = vld [vmem:[%s645_s29 + $0x8] sm:$0x1]  ;;  %797 = vmatpush.msra.mxu3 %v771_v22  ;;  %v874_v51 = vld [vmem:[%s4360_s5 + $0x38] sm:$0xff]  ;;  %s627_s1 = sand.u32 1, %s2673_s30  }
  0x22   : > { %s649_s2 = scalar_lea.vmem %s4419_s20, %s2333_s28  ;;  %v867_v36 = vld [vmem:[%s4360_s5] sm:$0xff]  ;;  %v872_v47 = vld [vmem:[%s4360_s5 + $0x28] sm:$0xff]  ;;  %v881_v52 = vld [vmem:[%s4361_s6 + $0x18] sm:$0xff]  ;;  %s2328_s20 = sshll.u32 %s627_s1, 2 }
  0x23   : > { %697 = vmatpush.msra.mxu0 %v664_v5  ;;  %v668_v21 = vld [vmem:[%s649_s2] sm:$0x3]  ;;  %856 = vmatpush.msrb.mxu3 %v838_v23  ;;  %s663_s2 = scalar_lea.vmem %s4373_s18, %s2333_s28  ;;  %v879_v48 = vld [vmem:[%s4361_s6 + $0x8] sm:$0xff]  ;;  %v877_v57 = vld [vmem:[%s4360_s5 + $0x50] sm:$0x1]  ;;  %s659_s28 = scalar_lea.vmem %s4359_s4, %s2534_s22 }
  0x24   : > { %2340 = vmatmul.msk.f32.vlgmr.msra.gmra.mxu0 %vm671_vm1, %v666_v6  ;;  %v871_v42 = vld [vmem:[%s4360_s5 + $0x20] sm:$0xff]  ;;  %v876_v55 = vld [vmem:[%s4360_s5 + $0x48] sm:$0xff]  ;;  %v884_v58 = vld [vmem:[%s4361_s6 + $0x30] sm:$0xff]  ;;  %s629_s25 = scalar_lea.vmem [#allocation3], %s2328_s20 }
  0x25   : > { %857 = vmatpush.msrb.mxu3 %v837_v24  ;;  %v878_v45 = vld [vmem:[%s4361_s6] sm:$0xff]  ;;  %v883_v56 = vld [vmem:[%s4361_s6 + $0x28] sm:$0xff]  ;;  %v885_v59 = vld [vmem:[%s4361_s6 + $0x38] sm:$0xff]  ;;  %s2187_s26 = sshll.u32 %s629_s25, 4  ;;  %s2188_s26 = int_to_ptr.vmem [resolvable:$true] %s2187_s26 }
  0x26   : > { %v875_v53 = vld [vmem:[%s4360_s5 + $0x40] sm:$0xff]  ;;  %v887_v61 = vld [vmem:[%s4361_s6 + $0x48] sm:$0xff]  ;;  %v888_v62 = vld [vmem:[%s4361_s6 + $0x50] sm:$0x1] }
  0x27   : > { %858 = vmatpush.msrb.mxu3 %v836_v25  ;;  %v882_v54 = vld [vmem:[%s4361_s6 + $0x20] sm:$0xff]  ;;  %v1095_v63 = vld [vmem:[%s4370_s15 + $0x18] sm:$0xff]  ;;  %v1094_v0 = vld [vmem:[%s4370_s15 + $0x10] sm:$0xff] }
  0x28   : > { %v886_v60 = vld [vmem:[%s4361_s6 + $0x40] sm:$0xff]  ;;  %1145 = vmatpush.msrb.mxu1 %v1095_v63  ;;  %v1093_v1 = vld [vmem:[%s4370_s15 + $0x8] sm:$0xff] }
  0x29   : > { %859 = vmatpush.msrb.mxu3 %v835_v26  ;;  %v1092_v2 = vld [vmem:[%s4370_s15] sm:$0xff] }
  0x2a   : > { %1146 = vmatpush.msrb.mxu1 %v1094_v0  ;;  %v2613_v6 = vld [vmem:[%s4369_s14] ss:$0 sm:$0xff] }
  0x2c   : > { %2341 = vmatmul.msk.f32.gmra.mxu0 %vm671_vm1, %v667_v7  ;;  %1147 = vmatpush.msrb.mxu1 %v1093_v1 }
  0x2e   : > { %1148 = vmatpush.msrb.mxu1 %v1092_v2 }
  0xa1   : > { %v699_v9 = vpop.f32.mrf.mxu0 }
  0xa2   : > { %2342 = vmatmul.msk.f32.vlgmr.msra.gmra.mxu1 %vm713_vm2, %v699_v9 }
  0xa9   : > { %v702_v10 = vpop.f32.mrf.mxu0 }
  0xaa   : > { %2343 = vmatmul.msk.f32.gmra.mxu1 %vm713_vm2, %v702_v10 }
 0x11f   : > { %v737_v14 = vpop.f32.mrf.mxu1 }
 0x120   : > { %v738_v17 = vadd.f32 %v2610_v15, %v737_v14 }
 0x122   : > { %v743_v20 = vmax.f32 %v738_v17, 0.0 }
 0x127   : > { %v740_v16 = vpop.f32.mrf.mxu1 }
 0x128   : > { %v741_v18 = vadd.f32 %v2610_v15, %v740_v16 }
 0x12a   : > { %v744_v19 = vmax.f32 %v741_v18, 0.0 }
 0x12c   : > { %2344 = vmatpush.msk.msra.mxu2 %vm4383_vm0, %v744_v19 }
 0x12e   : > { %766 = vmatpush.msra.mxu2 %v743_v20 }
 0x12f   : > { %2345 = vmatmul.msk.f32.vlgmr.msra.gmra.mxu2 %vm671_vm1, %v668_v21 }
 0x130   : > { %827 = vmatpush.msrb.mxu2 %v804_v28 }
 0x132   : > { %828 = vmatpush.msrb.mxu2 %v803_v29 }
 0x1b2   : > { %v768_v27 = vpop.f32.mrf.mxu2 }
 0x1b3   : > { %2346 = vmatmul.msk.f32.vlgmr.msra.gmra.mxu3 %vm713_vm2, %v768_v27 }
 0x1bb   : > { %2348 = vmatmul.msk.f32.vlgmr.msrb.gmra.mxu3 %vm713_vm2, %v743_v20 }
 0x1c3   : > { %2349 = vmatmul.msk.f32.gmra.mxu3 %vm713_vm2, %v744_v19 }
 0x236   : > { %v799_v31 = vpop.f32.mrf.mxu3 }
 0x237   : > { %v800_v32 = vadd.f32 %v2611_v30, %v799_v31 }
 0x239   : > { %v802_v33 = vmax.f32 %v800_v32, 0.0 }
 0x23b   : > { %2347 = vmatmul.msk.f32.vlgmr.msrb.gmra.mxu2 %vm809_vm3, %v802_v33 }
 0x23e   : > { %v861_v34 = vpop.f32.mrf.mxu3 }
 0x246   : > { %v864_v35 = vpop.f32.mrf.mxu3 }
 0x247   : > { %893 = vrot.lane.b32.xlu0 %v864_v35, %s2683_s21  ;;  %2362 = vmatpush.msk.msra.mxu2 %vm4383_vm0, %v864_v35 }
 0x249   : > { %1031 = vmatpush.msra.mxu2 %v861_v34 }
 0x24a   : > { %2363 = vmatmul.msk.f32.vlgmr.msra.gmra.mxu2 %vm671_vm1, %v867_v36 }
 0x24f   : > { %891 = vrot.lane.b32.xlu0 %v861_v34, %s2683_s21 }
 0x252   : > { %2364 = vmatmul.msk.f32.gmra.mxu2 %vm671_vm1, %v868_v37 }
 0x25a   : > { %2365 = vmatmul.msk.f32.gmra.mxu2 %vm671_vm1, %v869_v38 }
 0x262   : > { %2366 = vmatmul.msk.f32.gmra.mxu2 %vm671_vm1, %v870_v39 }
 0x26a   : > { %2367 = vmatmul.msk.f32.gmra.mxu2 %vm671_vm1, %v871_v42 }
 0x272   : > { %2368 = vmatmul.msk.f32.gmra.mxu2 %vm671_vm1, %v872_v47 }
 0x27a   : > { %2369 = vmatmul.msk.f32.gmra.mxu2 %vm671_vm1, %v873_v49 }
 0x282   : > { %2370 = vmatmul.msk.f32.gmra.mxu2 %vm671_vm1, %v874_v51 }
 0x28a   : > { %2371 = vmatmul.msk.f32.gmra.mxu2 %vm671_vm1, %v875_v53 }
 0x292   : > { %2372 = vmatmul.msk.f32.gmra.mxu2 %vm671_vm1, %v876_v55 }
 0x29a   : > { %2373 = vmatmul.msk.f32.gmra.mxu2 %vm671_vm1, %v877_v57 }
 0x2b9   : > { %v894_v40 = vpop.permute.xlu0 %893 }
 0x2ba   : > { %2350 = vmatpush.msk.msrb.mxu0 %vm4383_vm0, %v894_v40 }
 0x2be   : > { %v830_v43 = vpop.f32.mrf.mxu2 }
 0x2bf   : > { %v831_v44 = vadd.f32 %v2612_v41, %v830_v43 }
 0x2c1   : > { %834 = vst.msk [vmem:[%s663_s2] sm:$0x3] %vm833_vm4, %v831_v44  ;;  %v892_v46 = vpop.permute.xlu0 %891  ;;  %s2536_s2 = sshll.u32 %s2808_s12, 2  ;;  %s2170_s12 = scalar_lea.sflag [#allocation4], %s627_s1 }
 0x2c2   : > { %946 = vmatpush.msrb.mxu0 %v892_v46  ;;  %s2185_s22 = scalar_lea.hbm %s4372_s17, %s2536_s2  ;;  %s2639_s2 = scalar_lea.hbm %s4372_s17, 8 }
 0x2c3   : > { %2351 = vmatmul.msk.f32.vlgmr.msrb.gmra.mxu0 %vm671_vm1, %v878_v45 }
 0x2cb   : > { %2352 = vmatmul.msk.f32.gmra.mxu0 %vm671_vm1, %v879_v48 }
 0x2cd   : > { %v1033_v3 = vpop.f32.mrf.mxu2 }
 0x2d3   : > { %2353 = vmatmul.msk.f32.gmra.mxu0 %vm671_vm1, %v880_v50 }
 0x2d5   : > { %v1036_v4 = vpop.f32.mrf.mxu2 }
 0x2db   : > { %2354 = vmatmul.msk.f32.gmra.mxu0 %vm671_vm1, %v881_v52 }
 0x2dd   : > { %v1039_v5 = vpop.f32.mrf.mxu2 }
 0x2e3   : > { %2355 = vmatmul.msk.f32.gmra.mxu0 %vm671_vm1, %v882_v54 }
 0x2e5   : > { %v1042_v12 = vpop.f32.mrf.mxu2 }
 0x2eb   : > { %2356 = vmatmul.msk.f32.gmra.mxu0 %vm671_vm1, %v883_v56 }
 0x2ed   : > { %v1045_v18 = vpop.f32.mrf.mxu2 }
 0x2f3   : > { %2357 = vmatmul.msk.f32.gmra.mxu0 %vm671_vm1, %v884_v58 }
 0x2f5   : > { %v1048_v24 = vpop.f32.mrf.mxu2 }
 0x2fb   : > { %2358 = vmatmul.msk.f32.gmra.mxu0 %vm671_vm1, %v885_v59  ;;  %v2684_v59 = vmov 0  }
 0x2fc   : > { %2582 = vset.pattern.permute.xlu2 %v2684_v59  ;;  %2583 = vset.pattern.permute.xlu1 %v2684_v59 }
 0x2fd   : > { %v1051_v30 = vpop.f32.mrf.mxu2  ;;  %2586 = vset.pattern.permute.xlu0 %v2684_v59 }
 0x303   : > { %2359 = vmatmul.msk.f32.gmra.mxu0 %vm671_vm1, %v886_v60 }
 0x305   : > { %v1054_v36 = vpop.f32.mrf.mxu2 }
 0x30b   : > { %2360 = vmatmul.msk.f32.gmra.mxu0 %vm671_vm1, %v887_v61 }
 0x30d   : > { %v1057_v42 = vpop.f32.mrf.mxu2 }
 0x313   : > { %2361 = vmatmul.msk.f32.gmra.mxu0 %vm671_vm1, %v888_v62  ;;  %v3041_v62 = vld [vmem:[%s4371_s16] ss:$0 sm:$0xff] }
 0x315   : > { %v1060_v48 = vpop.f32.mrf.mxu2 }
 0x31d   : > { %v1063_v54 = vpop.f32.mrf.mxu2 }
 0x340   : > { %v948_v7 = vpop.f32.mrf.mxu0 }
 0x341   : > { %v1034_v8 = vadd.f32 %v1033_v3, %v948_v7  ;;  %v2685_v3 = vmov 1  }
 0x343   : > { %v1070_v9 = vadd.f32 %v2613_v6, %v1034_v8  ;;  %v2686_v8 = vmov 2  }
 0x345   : > { %v1081_v10 = vmax.f32 %v1070_v9, 0.0 }
 0x347   : > { %2374 = vmatmul.msk.f32.vlgmr.msrb.gmra.mxu1 %vm713_vm2, %v1081_v10 }
 0x348   : > { %v951_v11 = vpop.f32.mrf.mxu0 }
 0x349   : > { %v1037_v13 = vadd.f32 %v1036_v4, %v951_v11 }
 0x34b   : > { %v1071_v14 = vadd.f32 %v2613_v6, %v1037_v13 }
 0x34d   : > { %v1082_v15 = vmax.f32 %v1071_v14, 0.0 }
 0x34f   : > { %2375 = vmatmul.msk.f32.gmra.mxu1 %vm713_vm2, %v1082_v15 }
 0x350   : > { %v954_v16 = vpop.f32.mrf.mxu0 }
 0x351   : > { %v1040_v17 = vadd.f32 %v1039_v5, %v954_v16  ;;  %v1183_v16 = vlaneseq }
 0x353   : > { %v1072_v19 = vadd.f32 %v2613_v6, %v1040_v17  ;;  %v3073_v17 = vld [vmem:[%s659_s28] sm:$0xf]  ;;  %s2189_s28 = sshll.u32 %s2185_s22, 4  ;;  %s2190_s28 = int_to_ptr.hbm [resolvable:$true] %s2189_s28 }
 0x354   : > { %s2633_s27 = sshra.s32 %s2190_s28, 4  ;;  %s2634_s27 = int_to_ptr.hbm [resolvable:$true] %s2633_s27 }
 0x355   : > { %v1083_v20 = vmax.f32 %v1072_v19, 0.0  ;;  %v1744_v19 = vperm.slane %v3073_v17, 3  ;;  %s2635_s21 = scalar_lea.hbm %s2634_s27, 4  ;;  %p2640_p0 = scmp.lt.s32.totalorder %s2634_s27, %s4372_s17 }
 0x356   : > { %p2636_p11 = scmp.ne.s32.totalorder %s2634_s27, %s2635_s21  ;;  %p2641_p1 = scmp.lt.s32.totalorder %s2639_s2, %s2635_s21 }
 0x357   : > { %2376 = vmatmul.msk.f32.gmra.mxu1 %vm713_vm2, %v1083_v20 }
 0x358   : > { %v957_v21 = vpop.f32.mrf.mxu0  ;;  %p2637_p12 = pnand %p2636_p11, %p2825_p5  ;;  %p2642_p2 = por %p2641_p1, %p2640_p0 }
 0x359   : > { %v1043_v22 = vadd.f32 %v1042_v12, %v957_v21 }
 0x35a   : > { %p2638_p13 = pneg %p2637_p12 }
 0x35b   : > { %v1073_v23 = vadd.f32 %v2613_v6, %v1043_v22 }
 0x35c   : > { %p2643_p3 = pnand %p2642_p2, %p2638_p13 }
 0x35d   : > { %v1084_v25 = vmax.f32 %v1073_v23, 0.0 }
 0x35f   : > { %2377 = vmatmul.msk.f32.gmra.mxu1 %vm713_vm2, %v1084_v25 }
 0x360   : > { %v960_v26 = vpop.f32.mrf.mxu0 }
 0x361   : > { %v1046_v27 = vadd.f32 %v1045_v18, %v960_v26  ;;  %v3076_v18 = vshrl.u32 %v1183_v16, 7 }
 0x363   : > { %v1074_v28 = vadd.f32 %v2613_v6, %v1046_v27  ;;  %4420 = vst [vmem:[#allocation11_spill] sm:$0xff] %v3076_v18  ;;  %v1187_v20 = vadd.s32 24, %v3076_v18  ;;  %v1188_v27 = vadd.s32 32, %v3076_v18 }
 0x365   : > { %v1085_v29 = vmax.f32 %v1074_v28, 0.0  ;;  %v3082_v23 = vmul.u32 3, %v1187_v20  ;;  %v3094_v28 = vmul.u32 3, %v1188_v27  ;;  %v1229_v27 = vperm.slane %v3073_v17, 2 }
 0x367   : > { %2378 = vmatmul.msk.f32.gmra.mxu1 %vm713_vm2, %v1085_v29  ;;  %v3088_v26 = vadd.s32 1, %v3082_v23  ;;  %v3098_v29 = vadd.s32 1, %v3094_v28 }
 0x368   : > { %v963_v31 = vpop.f32.mrf.mxu0 }
 0x369   : > { %v1049_v32 = vadd.f32 %v1048_v24, %v963_v31  ;;  %v3084_v24 = vperm.slane %v1744_v19, 1 }
 0x36b   : > { %v1075_v33 = vadd.f32 %v2613_v6, %v1049_v32  ;;  %vm1842_vm5 = vcmp.eq.s32.totalorder %v3084_v24, %v3088_v26  ;;  %vm1844_vm6 = vcmp.eq.s32.totalorder %v3084_v24, %v3098_v29  ;;  %vm1756_vm8 = vcmp.eq.s32.totalorder %v3084_v24, %v3094_v28 }
 0x36c   : > { %vm1754_vm15 = vcmp.eq.s32.totalorder %v3084_v24, %v3082_v23 }
 0x36d   : > { %v1086_v34 = vmax.f32 %v1075_v33, 0.0  ;;  %v4381_v33 = vmov 0.0  }
 0x36f   : > { %2379 = vmatmul.msk.f32.gmra.mxu1 %vm713_vm2, %v1086_v34 }
 0x370   : > { %v966_v35 = vpop.f32.mrf.mxu0 }
 0x371   : > { %v1052_v37 = vadd.f32 %v1051_v30, %v966_v35  ;;  %v1186_v30 = vadd.s32 16, %v3076_v18  ;;  %v1190_v35 = vadd.s32 48, %v3076_v18 }
 0x373   : > { %v1076_v38 = vadd.f32 %v2613_v6, %v1052_v37  ;;  %v3109_v32 = vmul.u32 3, %v1186_v30 }
 0x375   : > { %v1087_v39 = vmax.f32 %v1076_v38, 0.0  ;;  %4421 = vst [vmem:[#allocation12_spill] sm:$0xff] %v3109_v32  ;;  %vm1752_vm7 = vcmp.eq.s32.totalorder %v3084_v24, %v3109_v32  ;;  %v3123_v38 = vmul.u32 3, %v1190_v35 }
 0x376   : > { %v2461_v34 = vsel %vm1752_vm7, 1.0, %v4381_v33 }
 0x377   : > { %2380 = vmatmul.msk.f32.gmra.mxu1 %vm713_vm2, %v1087_v39  ;;  %vm1760_vm9 = vcmp.eq.s32.totalorder %v3084_v24, %v3123_v38 }
 0x378   : > { %v969_v40 = vpop.f32.mrf.mxu0 }
 0x379   : > { %v1055_v41 = vadd.f32 %v1054_v36, %v969_v40  ;;  %v3135_v40 = vadd.s32 2, %v3123_v38 }
 0x37b   : > { %v1077_v43 = vadd.f32 %v2613_v6, %v1055_v41  ;;  %v2485_v41 = vsel %vm1842_vm5, 1.0, %v4381_v33  ;;  %vm1958_vm10 = vcmp.eq.s32.totalorder %v3084_v24, %v3135_v40 }
 0x37d   : > { %v1088_v44 = vmax.f32 %v1077_v43, 0.0 }
 0x37f   : > { %2381 = vmatmul.msk.f32.gmra.mxu1 %vm713_vm2, %v1088_v44  ;;  %v1189_v44 = vadd.s32 40, %v3076_v18 }
 0x380   : > { %v972_v45 = vpop.f32.mrf.mxu0 }
 0x381   : > { %v1058_v46 = vadd.f32 %v1057_v42, %v972_v45  ;;  %v3151_v45 = vmul.u32 3, %v1189_v44 }
 0x383   : > { %v1078_v47 = vadd.f32 %v2613_v6, %v1058_v46  ;;  %v3155_v46 = vadd.s32 2, %v3094_v28  ;;  %vm1758_vm11 = vcmp.eq.s32.totalorder %v3084_v24, %v3151_v45 }
 0x385   : > { %v1089_v49 = vmax.f32 %v1078_v47, 0.0  ;;  %v2487_v47 = vsel %vm1844_vm6, 1.0, %v4381_v33  ;;  %vm1954_vm12 = vcmp.eq.s32.totalorder %v3084_v24, %v3155_v46 }
 0x387   : > { %2382 = vmatmul.msk.f32.gmra.mxu1 %vm713_vm2, %v1089_v49 }
 0x388   : > { %v975_v50 = vpop.f32.mrf.mxu0 }
 0x389   : > { %v1061_v51 = vadd.f32 %v1060_v48, %v975_v50  ;;  %v1191_v48 = vadd.s32 56, %v3076_v18 }
 0x38b   : > { %v1079_v52 = vadd.f32 %v2613_v6, %v1061_v51  ;;  %v3171_v51 = vmul.u32 3, %v1191_v48 }
 0x38d   : > { %v1090_v53 = vmax.f32 %v1079_v52, 0.0  ;;  %v3174_v52 = vadd.s32 2, %v3151_v45  ;;  %vm1762_vm13 = vcmp.eq.s32.totalorder %v3084_v24, %v3171_v51 }
 0x38f   : > { %2383 = vmatmul.msk.f32.gmra.mxu1 %vm713_vm2, %v1090_v53  ;;  %4426 = vst [vmem:[#allocation17_spill] sm:$0xff] %v3174_v52  ;;  %v1228_v53 = vperm.slane %v3073_v17, 0  ;;  %vm1956_vm14 = vcmp.eq.s32.totalorder %v3084_v24, %v3174_v52 }
 0x390   : > { %v978_v55 = vpop.f32.mrf.mxu0 }
 0x391   : > { %v1064_v56 = vadd.f32 %v1063_v54, %v978_v55  ;;  %v3182_v54 = vadd.s32 1, %v3151_v45  ;;  %v3185_v55 = vadd.s32 2, %v3171_v51 }
 0x393   : > { %v1080_v57 = vadd.f32 %v2613_v6, %v1064_v56  ;;  %v3187_v56 = vperm.slane %v1228_v53, 0  ;;  %vm1846_vm1 = vcmp.eq.s32.totalorder %v3084_v24, %v3182_v54  ;;  %vm1960_vm3 = vcmp.eq.s32.totalorder %v3084_v24, %v3185_v55 }
 0x395   : > { %v1091_v58 = vmax.f32 %v1080_v57, 0.0  ;;  %v2463_v57 = vsel %vm1754_vm15, 1.0, %v4381_v33  ;;  %vm1381_vm4 = vcmp.eq.s32.totalorder %v3187_v56, %v3088_v26  ;;  %vm1240_vm6 = vcmp.eq.s32.totalorder %v3187_v56, %v3094_v28 }
 0x396   : > { %vm1537_vm15 = vcmp.eq.s32.totalorder %v3187_v56, %v3155_v46 }
 0x397   : > { %2384 = vmatmul.msk.f32.gmra.mxu1 %vm713_vm2, %v1091_v58  ;;  %vm1238_vm2 = vcmp.eq.s32.totalorder %v3187_v56, %v3082_v23  ;;  %v2469_v58 = vsel %vm1760_vm9, 1.0, %v4381_v33  ;;  %vm1383_vm9 = vcmp.eq.s32.totalorder %v3187_v56, %v3098_v29 }
 0x3c4   : > { %v3034_v60 = vpop.f32.mrf.mxu1 }
 0x3c5   : > { %v1151_v31 = vadd.f32 %v3041_v62, %v3034_v60 }
 0x3cc   : > { %v3036_v61 = vpop.f32.mrf.mxu1 }
 0x3cd   : > { %v1154_v39 = vadd.f32 %v3041_v62, %v3036_v61 }
 0x3d4   : > { %v1156_v63 = vpop.f32.mrf.mxu1 }
 0x3d5   : > { %v3044_v0 = vadd.f32 %v3041_v62, %v1156_v63 }
 0x3d7   : > { %1310 = vperm.xlu2 %2582, %v3044_v0  }
 0x3dc   : > { %v1159_v1 = vpop.f32.mrf.mxu1 }
 0x3dd   : > { %v3048_v2 = vadd.f32 %v3041_v62, %v1159_v1  ;;  %v2413_v1 = vsel %vm1381_vm4, 1.0, %v4381_v33 }
 0x3df   : > { %1315 = vperm.xlu1 %2583, %v3048_v2   ;;  %2584 = vset.pattern.permute.xlu2 %v2685_v3 }
 0x3e0   : > { %1454 = vperm.xlu2 %2584, %v3048_v2  }
 0x3e4   : > { %v1162_v4 = vpop.f32.mrf.mxu1 }
 0x3e5   : > { %v1163_v5 = vadd.f32 %v3041_v62, %v1162_v4  ;;  %v1192_v4 = vadd.s32 64, %v3076_v18 }
 0x3e7   : > { %1320 = vperm.xlu1 %2583, %v1163_v5  }
 0x3e8   : > { %1458 = vperm.xlu2 %2584, %v1163_v5  }
 0x3ec   : > { %v1165_v6 = vpop.f32.mrf.mxu1 }
 0x3ed   : > { %v1166_v7 = vadd.f32 %v3041_v62, %v1165_v6  ;;  %v2465_v6 = vsel %vm1756_vm8, 1.0, %v4381_v33 }
 0x3ef   : > { %1325 = vperm.xlu0 %2586, %v1166_v7   ;;  %2585 = vset.pattern.permute.xlu1 %v2686_v8 }
 0x3f0   : > { %1612 = vperm.xlu1 %2585, %v1163_v5   ;;  %2589 = vset.pattern.permute.xlu2 %v2684_v59 }
 0x3f4   : > { %v1168_v9 = vpop.f32.mrf.mxu1 }
 0x3f5   : > { %v1169_v10 = vadd.f32 %v3041_v62, %v1168_v9 }
 0x3f7   : > { %2588 = vset.pattern.permute.xlu0 %v2686_v8  ;;  %1330 = vperm.xlu2 %2589, %v1169_v10  }
 0x3f8   : > { %1616 = vperm.xlu0 %2588, %v1166_v7   ;;  %2587 = vset.pattern.permute.xlu1 %v2685_v3 }
 0x3f9   : > { %1462 = vperm.xlu1 %2587, %v1166_v7   ;;  %v2513_v7 = vsel %vm1958_vm10, 1.0, %v4381_v33 }
 0x3fc   : > { %v1171_v11 = vpop.f32.mrf.mxu1 }
 0x3fd   : > { %v1172_v12 = vadd.f32 %v3041_v62, %v1171_v11 }
 0x3ff   : > { %2590 = vset.pattern.permute.xlu2 %v2686_v8 }
 0x400   : > { %2592 = vset.pattern.permute.xlu0 %v2685_v3  ;;  %1620 = vperm.xlu2 %2590, %v1169_v10  }
 0x401   : > { %1470 = vperm.xlu0 %2592, %v1172_v12   ;;  %1466 = vperm.xlu1 %2587, %v1169_v10   ;;  %v2393_v10 = vsel %vm1240_vm6, 1.0, %v4381_v33 }
 0x404   : > { %v1174_v13 = vpop.f32.mrf.mxu1 }
 0x405   : > { %v1175_v14 = vadd.f32 %v3041_v62, %v1174_v13 }
 0x408   : > { %2591 = vset.pattern.permute.xlu2 %v2684_v59 }
 0x409   : > { %2594 = vset.pattern.permute.xlu1 %v2684_v59  ;;  %1335 = vperm.xlu2 %2591, %v1172_v12  }
 0x40a   : > { %1340 = vperm.xlu1 %2594, %v1175_v14   ;;  %2601 = vset.pattern.permute.xlu0 %v2686_v8 }
 0x40c   : > { %v1177_v15 = vpop.f32.mrf.mxu1 }
 0x40d   : > { %v1178_v25 = vadd.f32 %v3041_v62, %v1177_v15 }
 0x411   : > { %2593 = vset.pattern.permute.xlu2 %v2686_v8 }
 0x412   : > { %2596 = vset.pattern.permute.xlu1 %v2686_v8  ;;  %1624 = vperm.xlu2 %2593, %v1172_v12  }
 0x413   : > { %1628 = vperm.xlu1 %2596, %v1175_v14  }
 0x414   : > { %v1180_v21 = vpop.f32.mrf.mxu1 }
 0x415   : > { %v1181_v22 = vadd.f32 %v3041_v62, %v1180_v21  ;;  %v3211_v62 = vadd.s32 1, %v3171_v51  ;;  %v2467_v21 = vsel %vm1758_vm11, 1.0, %v4381_v33 }
 0x417   : > { %1636 = vperm.xlu0 %2601, %v1181_v22   ;;  %vm1850_vm5 = vcmp.eq.s32.totalorder %v3084_v24, %v3211_v62 }
 0x41a   : > { %2595 = vset.pattern.permute.xlu2 %v2685_v3 }
 0x41b   : > { %1632 = vperm.xlu1 %2596, %v1178_v25   ;;  %1474 = vperm.xlu2 %2595, %v1175_v14   ;;  %v2415_v14 = vsel %vm1383_vm9, 1.0, %v4381_v33 }
 0x41f   : > { %2602 = vset.pattern.permute.xlu0 %v2685_v3 }
 0x420   : > { %1450 = vperm.xlu0 %2602, %v3044_v0  }
 0x423   : > { %2599 = vset.pattern.permute.xlu1 %v2684_v59  ;;  %2597 = vset.pattern.permute.xlu2 %v2684_v59 }
 0x424   : > { %1350 = vperm.xlu1 %2599, %v1181_v22   ;;  %1345 = vperm.xlu2 %2597, %v1178_v25  }
 0x428   : > { %2607 = vset.pattern.permute.xlu0 %v2684_v59 }
 0x429   : > { %1300 = vperm.xlu0 %2607, %v1151_v31  }
 0x42c   : > { %2600 = vset.pattern.permute.xlu1 %v2685_v3  ;;  %2598 = vset.pattern.permute.xlu2 %v2685_v3 }
 0x42d   : > { %1482 = vperm.xlu1 %2600, %v1181_v22   ;;  %1478 = vperm.xlu2 %2598, %v1178_v25   ;;  %v2509_v22 = vsel %vm1954_vm12, 1.0, %v4381_v33  ;;  %vm1236_vm12 = vcmp.eq.s32.totalorder %v3187_v56, %v3109_v32 }
 0x431   : > { %v3117_v36 = vpop.permute.xlu2 %1310  ;;  %2609 = vset.pattern.permute.xlu0 %v2686_v8 }
 0x432   : > { %4422 = vst [vmem:[#allocation13_spill] sm:$0xff] %v3117_v36  ;;  %v3121_v37 = vmul.f32 %v2461_v34, %v3117_v36  ;;  %v1193_v34 = vadd.s32 72, %v3076_v18 }
 0x434   : > { %4423 = vst [vmem:[#allocation14_spill] sm:$0xff] %v3121_v37 }
 0x435   : > { %2603 = vset.pattern.permute.xlu1 %v2686_v8  ;;  %2604 = vset.pattern.permute.xlu2 %v2684_v59  ;;  %v2391_v59 = vsel %vm1238_vm2, 1.0, %v4381_v33 }
 0x436   : > { %1608 = vperm.xlu1 %2603, %v3048_v2   ;;  %1305 = vperm.xlu2 %2604, %v1154_v39  }
 0x43a   : > { %v3143_v42 = vpop.permute.xlu2 %1454 }
 0x43b   : > { %v3146_v43 = vmul.f32 %v2485_v41, %v3143_v42  ;;  %v1491_v5 = vmul.f32 %v2413_v1, %v3143_v42  ;;  %v3306_v1 = vmul.u32 3, %v1193_v34 }
 0x43d   : > { %4424 = vst [vmem:[#allocation15_spill] sm:$0xff] %v3146_v43  ;;  %vm1766_vm2 = vcmp.eq.s32.totalorder %v3084_v24, %v3306_v1 }
 0x43e   : > { %2605 = vset.pattern.permute.xlu1 %v2685_v3  ;;  %2606 = vset.pattern.permute.xlu2 %v2686_v8  ;;  %4436 = vst [vmem:[#allocation27_spill] sm:$0xff] %v3306_v1 }
 0x43f   : > { %1446 = vperm.xlu1 %2605, %v1154_v39   ;;  %1604 = vperm.xlu2 %2606, %v3044_v0   ;;  %v3217_v0 = vadd.s32 1, %v3123_v38 }
 0x441   : > { %vm1848_vm7 = vcmp.eq.s32.totalorder %v3084_v24, %v3217_v0 }
 0x442   : > { %v3164_v49 = vpop.permute.xlu2 %1458 }
 0x443   : > { %v3169_v50 = vmul.f32 %v2487_v47, %v3164_v49  ;;  %v1493_v20 = vmul.f32 %v2415_v14, %v3164_v49  ;;  %v1743_v47 = vperm.slane %v3073_v17, 1  ;;  %v2511_v17 = vsel %vm1956_vm14, 1.0, %v4381_v33 }
 0x444   : > { %v2515_v14 = vsel %vm1960_vm3, 1.0, %v4381_v33 }
 0x445   : > { %4425 = vst [vmem:[#allocation16_spill] sm:$0xff] %v3169_v50 }
 0x447   : > { %1600 = vperm.xlu2 %2606, %v1154_v39   ;;  %1442 = vperm.xlu1 %2605, %v1151_v31   ;;  %v2437_v39 = vsel %vm1537_vm15, 1.0, %v4381_v33 }
 0x44f   : > { %2608 = vset.pattern.permute.xlu1 %v2686_v8  ;;  %v3242_v8 = vmul.u32 3, %v1192_v4  ;;  %v2489_v4 = vsel %vm1846_vm1, 1.0, %v4381_v33 }
 0x450   : > { %1596 = vperm.xlu1 %2608, %v1151_v31   ;;  %v2471_v31 = vsel %vm1762_vm13, 1.0, %v4381_v33 }
 0x451   : > { %v3206_v60 = vpop.permute.xlu1 %1315  ;;  %v3208_v61 = vpop.permute.xlu2 %1330  ;;  %v3260_v19 = vadd.s32 1, %v3242_v8  ;;  %vm1764_vm8 = vcmp.eq.s32.totalorder %v3084_v24, %v3242_v8  ;;  %v3292_v44 = vadd.s32 2, %v3242_v8 }
 0x452   : > { %v3214_v63 = vmul.f32 %v2463_v57, %v3206_v60  ;;  %v3221_v2 = vmul.f32 %v2469_v58, %v3208_v61  ;;  %v1359_v3 = vmul.f32 %v2391_v59, %v3206_v60  ;;  %v3303_v58 = vperm.slane %v1229_v27, 0 }
 0x453   : > { %vm1852_vm10 = vcmp.eq.s32.totalorder %v3084_v24, %v3260_v19  ;;  %vm1962_vm11 = vcmp.eq.s32.totalorder %v3084_v24, %v3292_v44 }
 0x454   : > { %4427 = vst [vmem:[#allocation18_spill] sm:$0xff] %v3214_v63  ;;  %v3244_v9 = vadd.f32 %v1491_v5, %v1359_v3  ;;  %v3310_v3 = vperm.slane %v1743_v47, 1  ;;  %vm1382_vm13 = vcmp.eq.s32.totalorder %v3303_v58, %v3088_v26  ;;  %vm1384_vm14 = vcmp.eq.s32.totalorder %v3303_v58, %v3098_v29 }
 0x455   : > { %4428 = vst [vmem:[#allocation19_spill] sm:$0xff] %v3221_v2  ;;  %vm1239_vm6 = vcmp.eq.s32.totalorder %v3303_v58, %v3082_v23  ;;  %vm1241_vm9 = vcmp.eq.s32.totalorder %v3303_v58, %v3094_v28  ;;  %v2416_v34 = vsel %vm1384_vm14, 1.0, %v4381_v33  ;;  %v2495_v36 = vsel %vm1852_vm10, 1.0, %v4381_v33 }
 0x456   : > { %4429 = vst [vmem:[#allocation20_spill] sm:$0xff] %v3244_v9  ;;  %vm1841_vm4 = vcmp.eq.s32.totalorder %v3310_v3, %v3088_v26  ;;  %v3341_v26 = vadd.s32 1, %v3306_v1  ;;  %vm1843_vm1 = vcmp.eq.s32.totalorder %v3310_v3, %v3098_v29  ;;  %vm1753_vm3 = vcmp.eq.s32.totalorder %v3310_v3, %v3082_v23 }
 0x457   : > { %4435 = vst [vmem:[#allocation26_spill] sm:$0xff] %v3303_v58  ;;  %v1194_v29 = vadd.s32 80, %v3076_v18  ;;  %vm1755_vm15 = vcmp.eq.s32.totalorder %v3310_v3, %v3094_v28  ;;  %v3376_v47 = vsel %vm1239_vm6, 1.0, %v4381_v33  ;;  %vm1759_vm14 = vcmp.eq.s32.totalorder %v3310_v3, %v3123_v38 }
 0x458   : > { %v3390_v28 = vsel %vm1241_vm9, 1.0, %v4381_v33  ;;  %vm1542_vm6 = vcmp.eq.s32.totalorder %v3303_v58, %v3135_v40  ;;  %v3416_v37 = vsel %vm1759_vm14, 1.0, %v4381_v33  ;;  %vm1243_vm10 = vcmp.eq.s32.totalorder %v3303_v58, %v3151_v45 }
 0x459   : > { %v3247_v11 = vpop.permute.xlu1 %1320  ;;  %vm1845_vm0 = vcmp.eq.s32.totalorder %v3310_v3, %v3182_v54 }
 0x45a   : > { %v3250_v12 = vmul.f32 %v2465_v6, %v3247_v11  ;;  %v3252_v13 = vpop.permute.xlu2 %1620  ;;  %v1361_v16 = vmul.f32 %v2393_v10, %v3247_v11  ;;  %v3331_v6 = vsel %vm1236_vm12, 1.0, %v4381_v33  ;;  %vm1854_vm12 = vcmp.eq.s32.totalorder %v3084_v24, %v3341_v26 }
 0x45b   : > { %v3256_v15 = vmul.f32 %v2513_v7, %v3252_v13  ;;  %4438 = vst [vmem:[#allocation29_spill] sm:$0xff] %v3331_v6  ;;  %v2414_v7 = vsel %vm1382_vm13, 1.0, %v4381_v33  ;;  %vm1244_vm13 = vcmp.eq.s32.totalorder %v3187_v56, %v3123_v38 }
 0x45c   : > { %4430 = vst [vmem:[#allocation21_spill] sm:$0xff] %v3250_v12  ;;  %v1515_v25 = vadd.f32 %v1493_v20, %v1361_v16 }
 0x45d   : > { %4431 = vst [vmem:[#allocation22_spill] sm:$0xff] %v3256_v15 }
 0x461   : > { %v3278_v30 = vpop.permute.xlu0 %1325 }
 0x462   : > { %v3286_v35 = vmul.f32 %v2467_v21, %v3278_v30  ;;  %v3289_v41 = vpop.permute.xlu1 %1612  ;;  %v2484_v21 = vsel %vm1841_vm4, 1.0, %v4381_v33  ;;  %vm1245_vm4 = vcmp.eq.s32.totalorder %v3303_v58, %v3123_v38  ;;  %v2493_v38 = vsel %vm1850_vm5, 1.0, %v4381_v33 }
 0x463   : > { %v3296_v48 = vmul.f32 %v2509_v22, %v3289_v41  ;;  %v3298_v53 = vpop.permute.xlu2 %1335  ;;  %v1647_v59 = vmul.f32 %v2437_v39, %v3289_v41  ;;  %v2486_v39 = vsel %vm1843_vm1, 1.0, %v4381_v33  ;;  %vm1541_vm1 = vcmp.eq.s32.totalorder %v3187_v56, %v3135_v40 }
 0x464   : > { %4432 = vst [vmem:[#allocation23_spill] sm:$0xff] %v3286_v35  ;;  %v3301_v57 = vmul.f32 %v2471_v31, %v3298_v53  ;;  %v3371_v31 = vadd.s32 2, %v3306_v1  ;;  %v3423_v9 = vsel %vm1541_vm1, 1.0, %v4381_v33  ;;  %vm1246_vm1 = vcmp.eq.s32.totalorder %v3187_v56, %v3171_v51 }
 0x465   : > { %4433 = vst [vmem:[#allocation24_spill] sm:$0xff] %v3296_v48  ;;  %v3328_v5 = vadd.f32 %v1647_v59, %v1515_v25  ;;  %v3381_v59 = vsel %vm1753_vm3, 1.0, %v4381_v33  ;;  %vm1957_vm3 = vcmp.eq.s32.totalorder %v3310_v3, %v3135_v40  ;;  %v2491_v40 = vsel %vm1848_vm7, 1.0, %v4381_v33 }
 0x466   : > { %4434 = vst [vmem:[#allocation25_spill] sm:$0xff] %v3301_v57  ;;  %vm1964_vm9 = vcmp.eq.s32.totalorder %v3084_v24, %v3371_v31  ;;  %v3442_v48 = vsel %vm1957_vm3, 1.0, %v4381_v33  ;;  %vm1242_vm7 = vcmp.eq.s32.totalorder %v3187_v56, %v3151_v45  ;;  %vm1761_vm3 = vcmp.eq.s32.totalorder %v3310_v3, %v3171_v51 }
 0x467   : > { %4437 = vst [vmem:[#allocation28_spill] sm:$0xff] %v3328_v5  ;;  %vm1544_vm5 = vcmp.eq.s32.totalorder %v3303_v58, %v3185_v55 }
 0x46a   : > { %v3334_v10 = vpop.permute.xlu0 %1616 }
 0x46b   : > { %4439 = vst [vmem:[#allocation30_spill] sm:$0xff] %v3334_v10  ;;  %v3350_v16 = vmul.f32 %v2511_v17, %v3334_v10  ;;  %v3352_v20 = vpop.permute.xlu1 %1462  ;;  %v3393_v17 = vsel %vm1755_vm15, 1.0, %v4381_v33  ;;  %vm1757_vm15 = vcmp.eq.s32.totalorder %v3310_v3, %v3151_v45  ;;  %v3470_v45 = vmul.f32 %v2414_v7, %v3143_v42 }
 0x46c   : > { %v3358_v22 = vmul.f32 %v2489_v4, %v3352_v20  ;;  %v3360_v25 = vpop.permute.xlu2 %1624  ;;  %v3397_v4 = vmul.u32 3, %v1194_v29  ;;  %v3413_v29 = vsel %vm1245_vm4, 1.0, %v4381_v33  ;;  %vm1953_vm4 = vcmp.eq.s32.totalorder %v3310_v3, %v3155_v46 }
 0x46d   : > { %4440 = vst [vmem:[#allocation31_spill] sm:$0xff] %v3350_v16  ;;  %v3368_v27 = vmul.f32 %v2515_v14, %v3360_v25  ;;  %v3410_v14 = vsel %vm1244_vm13, 1.0, %v4381_v33  ;;  %vm1538_vm13 = vcmp.eq.s32.totalorder %v3303_v58, %v3155_v46  ;;  %v3481_v46 = vmul.f32 %v2416_v34, %v3164_v49 }
 0x46e   : > { %4441 = vst [vmem:[#allocation32_spill] sm:$0xff] %v3358_v22  ;;  %v3434_v15 = vadd.s32 2, %v3397_v4 }
 0x46f   : > { %4442 = vst [vmem:[#allocation33_spill] sm:$0xff] %v3368_v27  ;;  %v3439_v27 = vsel %vm1542_vm6, 1.0, %v4381_v33  ;;  %v1185_v33 = vadd.s32 8, %v3076_v18  ;;  %vm1247_vm6 = vcmp.eq.s32.totalorder %v3303_v58, %v3171_v51 }
 0x470   : > { %4447 = vst [vmem:[#allocation38_spill] sm:$0xff] %v3470_v45  ;;  %vm1966_vm14 = vcmp.eq.s32.totalorder %v3084_v24, %v3434_v15 }
 0x471   : > { %4450 = vst [vmem:[#allocation40_spill] sm:$0xff] %v3481_v46  ;;  %v3500_v34 = vmul.u32 3, %v1185_v33  ;;  %v3581_v46 = vmul.u32 3, %v3076_v18 }
 0x473   : > { %v3425_v5 = vpop.permute.xlu0 %1470  ;;  %v3427_v6 = vpop.permute.xlu1 %1466 }
 0x474   : > { %4443 = vst [vmem:[#allocation34_spill] sm:$0xff] %v3425_v5  ;;  %v3447_v16 = vmul.f32 %v2493_v38, %v3425_v5  ;;  %v3454_v2 = vmul.f32 %v2491_v40, %v3427_v6  ;;  %v3473_v40 = vmul.f32 %v2484_v21, %v3143_v42  ;;  %v3492_v42 = vmul.f32 %v2486_v39, %v3164_v49 }
 0x475   : > { %v3456_v57 = vpop.permute.xlu2 %1474  ;;  %v3585_v5 = vmul.f32 %v3376_v47, %v3206_v60  ;;  %v3613_v47 = vadd.s32 1, %v3397_v4 }
 0x476   : > { %4444 = vst [vmem:[#allocation35_spill] sm:$0xff] %v3447_v16  ;;  %v3464_v38 = vmul.f32 %v2495_v36, %v3456_v57  ;;  %v3467_v16 = vadd.s32 1, %v3109_v32 }
 0x477   : > { %4445 = vst [vmem:[#allocation36_spill] sm:$0xff] %v3454_v2  ;;  %v4449_v2 = vmov 0.0  }
 0x478   : > { %4446 = vst [vmem:[#allocation37_spill] sm:$0xff] %v3464_v38  ;;  %v3476_v43 = vsel %vm1242_vm7, 1.0, %v4449_v2  ;;  %v3484_v36 = vsel %vm1243_vm10, 1.0, %v4449_v2  ;;  %v3487_v38 = vsel %vm1757_vm15, 1.0, %v4449_v2  ;;  %v3495_v7 = vsel %vm1538_vm13, 1.0, %v4449_v2 }
 0x479   : > { %4448 = vst [vmem:[#allocation39_spill] sm:$0xff] %v3473_v40  ;;  %v3498_v21 = vsel %vm1953_vm4, 1.0, %v4449_v2  ;;  %v2473_v49 = vsel %vm1764_vm8, 1.0, %v4449_v2  ;;  %vm1840_vm7 = vcmp.eq.s32.totalorder %v3084_v24, %v3467_v16  ;;  %v3513_v39 = vsel %vm1246_vm1, 1.0, %v4449_v2 }
 0x47a   : > { %4451 = vst [vmem:[#allocation41_spill] sm:$0xff] %v3492_v42  ;;  %vm1539_vm10 = vcmp.eq.s32.totalorder %v3187_v56, %v3174_v52  ;;  %vm1955_vm15 = vcmp.eq.s32.totalorder %v3310_v3, %v3174_v52  ;;  %vm1750_vm13 = vcmp.eq.s32.totalorder %v3084_v24, %v3500_v34  ;;  %vm1385_vm4 = vcmp.eq.s32.totalorder %v3187_v56, %v3182_v54 }
 0x47b   : > { %vm1386_vm8 = vcmp.eq.s32.totalorder %v3303_v58, %v3182_v54  ;;  %v2475_v63 = vsel %vm1766_vm2, 1.0, %v4449_v2  ;;  %v3534_v52 = vsel %vm1247_vm6, 1.0, %v4449_v2  ;;  %vm1543_vm1 = vcmp.eq.s32.totalorder %v3187_v56, %v3185_v55 }
 0x47c   : > { %v3527_v33 = vpop.permute.xlu1 %1340  ;;  %v3547_v54 = vsel %vm1761_vm3, 1.0, %v4449_v2  ;;  %v3550_v12 = vsel %vm1539_vm10, 1.0, %v4449_v2  ;;  %v3553_v22 = vsel %vm1955_vm15, 1.0, %v4449_v2  ;;  %vm1959_vm2 = vcmp.eq.s32.totalorder %v3310_v3, %v3185_v55 }
 0x47d   : > { %v3541_v50 = vmul.f32 %v2473_v49, %v3527_v33  ;;  %v3560_v49 = vsel %vm1385_vm4, 1.0, %v4449_v2  ;;  %v3566_v51 = vsel %vm1845_vm0, 1.0, %v4449_v2  ;;  %v3572_v42 = vsel %vm1543_vm1, 1.0, %v4449_v2 }
 0x47e   : > { %v3557_v35 = vpop.permute.xlu2 %1345  ;;  %v3575_v45 = vsel %vm1544_vm5, 1.0, %v4449_v2  ;;  %v3578_v55 = vadd.s32 2, %v3109_v32  ;;  %vm1389_vm0 = vcmp.eq.s32.totalorder %v3187_v56, %v3211_v62  ;;  %vm1390_vm5 = vcmp.eq.s32.totalorder %v3303_v58, %v3211_v62 }
 0x47f   : > { %4452 = vst [vmem:[#allocation42_spill] sm:$0xff] %v3541_v50  ;;  %v3563_v50 = vsel %vm1386_vm8, 1.0, %v4449_v2  ;;  %v3569_v40 = vmul.f32 %v2475_v63, %v3557_v35  ;;  %v3589_v63 = vmul.f32 %v3381_v59, %v3206_v60  ;;  %vm1849_vm6 = vcmp.eq.s32.totalorder %v3310_v3, %v3211_v62 }
 0x480   : > { %4453 = vst [vmem:[#allocation43_spill] sm:$0xff] %v3557_v35  ;;  %vm1387_vm3 = vcmp.eq.s32.totalorder %v3187_v56, %v3217_v0  ;;  %vm1950_vm10 = vcmp.eq.s32.totalorder %v3084_v24, %v3578_v55  ;;  %vm1388_vm15 = vcmp.eq.s32.totalorder %v3303_v58, %v3217_v0  ;;  %vm1847_vm4 = vcmp.eq.s32.totalorder %v3310_v3, %v3217_v0 }
 0x481   : > { %4454 = vst [vmem:[#allocation44_spill] sm:$0xff] %v3569_v40  ;;  %v3592_v40 = vsel %vm1959_vm2, 1.0, %v4449_v2  ;;  %v2517_v60 = vsel %vm1962_vm11, 1.0, %v4449_v2  ;;  %v3617_v62 = vmul.f32 %v3410_v14, %v3208_v61  ;;  %v3621_v59 = vmul.f32 %v3413_v29, %v3208_v61 }
 0x482   : > { %4455 = vst [vmem:[#allocation45_spill] sm:$0xff] %v3589_v63  ;;  %v3625_v32 = vmul.f32 %v3416_v37, %v3208_v61  ;;  %vm1748_vm8 = vcmp.eq.s32.totalorder %v3084_v24, %v3581_v46  ;;  %v3630_v0 = vsel %vm1389_vm0, 1.0, %v4449_v2  ;;  %v3633_v18 = vsel %vm1390_vm5, 1.0, %v4449_v2 }
 0x483   : > { %4456 = vst [vmem:[#allocation46_spill] sm:$0xff] %v3617_v62  ;;  %v3636_v14 = vsel %vm1849_vm6, 1.0, %v4449_v2  ;;  %v2497_v37 = vsel %vm1854_vm12, 1.0, %v4449_v2  ;;  %v3645_v61 = vsel %vm1387_vm3, 1.0, %v4449_v2  ;;  %v3648_v29 = vsel %vm1388_vm15, 1.0, %v4449_v2 }
 0x484   : > { %4457 = vst [vmem:[#allocation47_spill] sm:$0xff] %v3625_v32  ;;  %v3651_v62 = vsel %vm1847_vm4, 1.0, %v4449_v2  ;;  %v3658_v32 = vmul.f32 %v3390_v28, %v3247_v11  ;;  %vm1856_vm11 = vcmp.eq.s32.totalorder %v3084_v24, %v3613_v47  ;;  %vm1248_vm12 = vcmp.eq.s32.totalorder %v3187_v56, %v3242_v8 }
 0x485   : > { %4458 = vst [vmem:[#allocation48_spill] sm:$0xff] %v3630_v0  ;;  %v3638_v63 = vpop.permute.xlu1 %1628  ;;  %vm1249_vm1 = vcmp.eq.s32.totalorder %v3303_v58, %v3242_v8  ;;  %vm1392_vm2 = vcmp.eq.s32.totalorder %v3303_v58, %v3260_v19  ;;  %vm1851_vm0 = vcmp.eq.s32.totalorder %v3310_v3, %v3260_v19  ;;  %vm1763_vm5 = vcmp.eq.s32.totalorder %v3310_v3, %v3242_v8 }
 0x486   : > { %4459 = vst [vmem:[#allocation49_spill] sm:$0xff] %v3636_v14  ;;  %v3654_v35 = vmul.f32 %v2517_v60, %v3638_v63  ;;  %v3669_v14 = vadd.s32 2, %v3500_v34  ;;  %v3673_v60 = vmul.f32 %v3393_v17, %v3247_v11  ;;  %v3694_v17 = vmul.f32 %v3423_v9, %v3252_v13 }
 0x487   : > { %4460 = vst [vmem:[#allocation50_spill] sm:$0xff] %v3645_v61  ;;  %v3660_v0 = vpop.permute.xlu2 %1478  ;;  %v2521_v61 = vsel %vm1966_vm14, 1.0, %v4449_v2  ;;  %vm1391_vm14 = vcmp.eq.s32.totalorder %v3187_v56, %v3260_v19  ;;  %v3708_v19 = vsel %vm1248_vm12, 1.0, %v4449_v2  ;;  %v2402_v8 = vsel %vm1249_vm1, 1.0, %v4449_v2 }
 0x488   : > { %4461 = vst [vmem:[#allocation51_spill] sm:$0xff] %v3654_v35  ;;  %v3680_v28 = vmul.f32 %v2497_v37, %v3660_v0  ;;  %v3698_v37 = vmul.f32 %v3439_v27, %v3252_v13  ;;  %v2519_v9 = vsel %vm1964_vm9, 1.0, %v4449_v2  ;;  %vm1948_vm6 = vcmp.eq.s32.totalorder %v3084_v24, %v3669_v14 }
 0x489   : > { %4462 = vst [vmem:[#allocation52_spill] sm:$0xff] %v3669_v14  ;;  %v3690_v11 = vpop.permute.xlu0 %1636  ;;  %v3718_v27 = vsel %vm1391_vm14, 1.0, %v4449_v2  ;;  %v3735_v14 = vmul.f32 %v3487_v38, %v3278_v30  ;;  %vm1546_vm9 = vcmp.eq.s32.totalorder %v3303_v58, %v3292_v44  ;;  %v3757_v38 = vmul.f32 %v3498_v21, %v3289_v41 }
 0x48a   : > { %4463 = vst [vmem:[#allocation53_spill] sm:$0xff] %v3673_v60  ;;  %v3705_v35 = vmul.f32 %v2521_v61, %v3690_v11  ;;  %v3725_v61 = vsel %vm1763_vm5, 1.0, %v4449_v2  ;;  %v1364_v60 = vmul.f32 %v3484_v36, %v3278_v30  ;;  %vm1545_vm3 = vcmp.eq.s32.totalorder %v3187_v56, %v3292_v44 }
 0x48b   : > { %4464 = vst [vmem:[#allocation54_spill] sm:$0xff] %v3680_v28  ;;  %v3702_v28 = vmul.f32 %v3442_v48, %v3252_v13  ;;  %v2424_v13 = vsel %vm1392_vm2, 1.0, %v4449_v2  ;;  %v3722_v48 = vsel %vm1851_vm0, 1.0, %v4449_v2  ;;  %vm1961_vm15 = vcmp.eq.s32.totalorder %v3310_v3, %v3292_v44 }
 0x48c   : > { %4465 = vst [vmem:[#allocation55_spill] sm:$0xff] %v3690_v11  ;;  %v3744_v11 = vmul.f32 %v3495_v7, %v3289_v41  ;;  %vm1765_vm12 = vcmp.eq.s32.totalorder %v3310_v3, %v3306_v1  ;;  %v2483_v44 = vsel %vm1840_vm7, 1.0, %v4449_v2  ;;  %v1368_v36 = vmul.f32 %v3534_v52, %v3298_v53 }
 0x48d   : > { %4466 = vst [vmem:[#allocation56_spill] sm:$0xff] %v3694_v17  ;;  %v3729_v17 = vmul.f32 %v3476_v43, %v3278_v30  ;;  %v2459_v30 = vsel %vm1750_vm13, 1.0, %v4449_v2  ;;  %vm1250_vm13 = vcmp.eq.s32.totalorder %v3187_v56, %v3306_v1  ;;  %v1827_v7 = vmul.f32 %v3547_v54, %v3298_v53 }
 0x48e   : > { %4467 = vst [vmem:[#allocation57_spill] sm:$0xff] %v3702_v28  ;;  %v3737_v28 = vpop.permute.xlu1 %1632  ;;  %v2446_v21 = vsel %vm1546_vm9, 1.0, %v4449_v2  ;;  %v3792_v1 = vsel %vm1961_vm15, 1.0, %v4449_v2  ;;  %v3797_v52 = vadd.s32 1, %v3500_v34  ;;  %v2403_v54 = vsel %vm1250_vm13, 1.0, %v4449_v2 }
 0x48f   : > { %4468 = vst [vmem:[#allocation58_spill] sm:$0xff] %v3705_v35  ;;  %v3740_v35 = vadd.s32 2, %v3082_v23  ;;  %v3749_v43 = vmul.f32 %v2519_v9, %v3737_v28  ;;  %v3767_v23 = vmul.f32 %v3513_v39, %v3298_v53  ;;  %v1370_v9 = vmul.f32 %v2402_v8, %v3527_v33 }
 0x490   : > { %4470 = vst [vmem:[#allocation60_spill] sm:$0xff] %v3757_v38  ;;  %v3773_v41 = vpop.permute.xlu2 %1305  ;;  %v3801_v53 = vmul.f32 %v3550_v12, %v3334_v10  ;;  %v1656_v38 = vmul.f32 %v2446_v21, %v3638_v63  ;;  %vm4478_vm7 = vcmp.eq.s32.totalorder %v3084_v24, %v3397_v4  ;;  %vm1838_vm1 = vcmp.eq.s32.totalorder %v3084_v24, %v3797_v52 }
 0x491   : > { %4469 = vst [vmem:[#allocation59_spill] sm:$0xff] %v3749_v43  ;;  %vm1952_vm4 = vcmp.eq.s32.totalorder %v3084_v24, %v3740_v35  ;;  %v3785_v39 = vmul.f32 %v2459_v30, %v3773_v41  ;;  %v3789_v43 = vsel %vm1545_vm3, 1.0, %v4449_v2  ;;  %v3805_v30 = vsel %vm1765_vm12, 1.0, %v4449_v2 }
 0x492   : > { %4471 = vst [vmem:[#allocation61_spill] sm:$0xff] %v3773_v41  ;;  %v3794_v58 = vpop.permute.xlu0 %1450  ;;  %v1502_v41 = vmul.f32 %v2424_v13, %v3456_v57  ;;  %v2477_v12 = vsel %vm4478_vm7, 1.0, %v4449_v2  ;;  %v3832_v13 = vmul.f32 %v3566_v51, %v3352_v20  ;;  %v3836_v21 = vmul.f32 %v3572_v42, %v3360_v25 }
 0x493   : > { %4472 = vst [vmem:[#allocation62_spill] sm:$0xff] %v3785_v39  ;;  %v3808_v8 = vmul.f32 %v2483_v44, %v3794_v58  ;;  %v3812_v39 = vmul.f32 %v3553_v22, %v3334_v10  ;;  %v1496_v44 = vmul.f32 %v3563_v50, %v3352_v20  ;;  %v1498_v22 = vmul.f32 %v3648_v29, %v3427_v6  ;;  %v4480_v10 = vld [vmem:[#allocation34_spill] sm:$0xff] }
 0x494   : > { %4473 = vst [vmem:[#allocation63_spill] sm:$0xff] %v3794_v58  ;;  %v1524_v50 = vadd.f32 %v1502_v41, %v1370_v9  ;;  %v1654_v29 = vmul.f32 %v3575_v45, %v3360_v25  ;;  %vm1393_vm14 = vcmp.eq.s32.totalorder %v3187_v56, %v3341_v26  ;;  %vm1547_vm2 = vcmp.eq.s32.totalorder %v3187_v56, %v3371_v31  ;;  %v4483_v9 = vld [vmem:[#allocation40_spill] sm:$0xff]  ;;  %v4484_v58 = vld [vmem:[#allocation38_spill] sm:$0xff] }
 0x495   : > { %4474 = vst [vmem:[#allocation64_spill] sm:$0xff] %v3797_v52  ;;  %vm1252_vm0 = vcmp.eq.s32.totalorder %v3187_v56, %v3397_v4  ;;  %v1520_v51 = vadd.f32 %v1498_v22, %v3621_v59  ;;  %v3863_v41 = vadd.f32 %v1496_v44, %v1364_v60  ;;  %v3869_v52 = vadd.f32 %v4484_v58, %v3585_v5  ;;  %v4487_v60 = vld [vmem:[#allocation49_spill] sm:$0xff]  ;;  %v4488_v5 = vld [vmem:[#allocation48_spill] sm:$0xff]  ;;  %v4489_v22 = vld [vmem:[#allocation50_spill] sm:$0xff] }
 0x496   : > { %4475 = vst [vmem:[#allocation65_spill] sm:$0xff] %v3801_v53  ;;  %v3822_v53 = vmul.f32 %v3560_v49, %v3352_v20  ;;  %v1500_v49 = vmul.f32 %v3633_v18, %v4480_v10  ;;  %v2505_v20 = vsel %vm1950_vm10, 1.0, %v4449_v2  ;;  %v3856_v18 = vadd.s32 1, %v3581_v46 }
 0x497   : > { %4476 = vst [vmem:[#allocation66_spill] sm:$0xff] %v3805_v30  ;;  %v3858_v45 = vadd.f32 %v1656_v38, %v1524_v50  ;;  %vm1549_vm10 = vcmp.eq.s32.totalorder %v3187_v56, %v3434_v15  ;;  %vm1395_vm5 = vcmp.eq.s32.totalorder %v3187_v56, %v3613_v47  ;;  %v2025_v59 = vmul.f32 %v3592_v40, %v3360_v25 }
 0x498   : > { %4477 = vst [vmem:[#allocation67_spill] sm:$0xff] %v3808_v8  ;;  %v3840_v8 = vpop.permute.xlu1 %1350  ;;  %v1522_v38 = vadd.f32 %v1500_v49, %v1368_v36  ;;  %v1913_v58 = vmul.f32 %v3651_v62, %v3427_v6  ;;  %vm1836_vm9 = vcmp.eq.s32.totalorder %v3084_v24, %v3856_v18  ;;  %v1499_v44 = vmul.f32 %v4488_v5, %v4480_v10 }
 0x499   : > { %4479 = vst [vmem:[#allocation68_spill] sm:$0xff] %v3822_v53  ;;  %v1834_v30 = vmul.f32 %v2477_v12, %v3840_v8  ;;  %v3860_v42 = vpop.permute.xlu2 %1604  ;;  %v1516_v12 = vadd.f32 %v4483_v9, %v3658_v32  ;;  %v1915_v32 = vmul.f32 %v4487_v60, %v4480_v10  ;;  %v1497_v50 = vmul.f32 %v4489_v22, %v3427_v6 }
 0x49a   : > { %4481 = vst [vmem:[#allocation34_spill] sm:$0xff] %v3858_v45  ;;  %v3874_v53 = vmul.f32 %v2505_v20, %v3860_v42  ;;  %v2425_v25 = vsel %vm1393_vm14, 1.0, %v4449_v2  ;;  %v2447_v40 = vsel %vm1547_vm2, 1.0, %v4449_v2  ;;  %v2449_v62 = vsel %vm1549_vm10, 1.0, %v4449_v2 }
 0x49b   : > { %4482 = vst [vmem:[#allocation69_spill] sm:$0xff] %v3863_v41  ;;  %v2405_v10 = vsel %vm1252_vm0, 1.0, %v4449_v2  ;;  %v2427_v36 = vsel %vm1395_vm5, 1.0, %v4449_v2  ;;  %v2499_v6 = vsel %vm1856_vm11, 1.0, %v4449_v2  ;;  %v1369_v49 = vmul.f32 %v3708_v19, %v3527_v33  ;;  %v4490_v41 = vld [vmem:[#allocation47_spill] sm:$0xff] }
 0x49c   : > { %4485 = vst [vmem:[#allocation40_spill] sm:$0xff] %v3869_v52  ;;  %v3911_v20 = vadd.s32 2, %v3581_v46  ;;  %v3913_v9 = vadd.f32 %v1654_v29, %v1522_v38  ;;  %v3916_v60 = vadd.f32 %v3698_v37, %v1520_v51  ;;  %v1503_v5 = vmul.f32 %v2425_v25, %v3660_v0 }
 0x49d   : > { %4486 = vst [vmem:[#allocation38_spill] sm:$0xff] %v3874_v53  ;;  %v3922_v52 = vadd.f32 %v3744_v11, %v1516_v12  ;;  %v1937_v53 = vadd.f32 %v1915_v32, %v1827_v7  ;;  %v1935_v45 = vadd.f32 %v1913_v58, %v4490_v41  ;;  %v1501_v19 = vmul.f32 %v3718_v27, %v3456_v57  ;;  %v4491_v11 = vld [vmem:[#allocation43_spill] sm:$0xff] }
 0x49e   : > { %vm1853_vm11 = vcmp.eq.s32.totalorder %v3310_v3, %v3341_v26  ;;  %v1373_v29 = vmul.f32 %v2405_v10, %v3840_v8  ;;  %v1917_v38 = vmul.f32 %v3722_v48, %v3456_v57  ;;  %v1371_v12 = vmul.f32 %v2403_v54, %v4491_v11  ;;  %v4492_v41 = vld [vmem:[#allocation55_spill] sm:$0xff] }
 0x49f   : > { %v1657_v7 = vmul.f32 %v2447_v40, %v3737_v28  ;;  %vm1946_vm3 = vcmp.eq.s32.totalorder %v3084_v24, %v3911_v20  ;;  %v1829_v27 = vmul.f32 %v3725_v61, %v3527_v33  ;;  %v1659_v32 = vmul.f32 %v2449_v62, %v4492_v41  ;;  %v4493_v33 = vld [vmem:[#allocation58_spill] sm:$0xff] }
 0x4a0   : > { %v3919_v22 = vpop.permute.xlu1 %1482  ;;  %vm1963_vm15 = vcmp.eq.s32.totalorder %v3310_v3, %v3371_v31  ;;  %vm1234_vm13 = vcmp.eq.s32.totalorder %v3187_v56, %v3500_v34  ;;  %vm1379_vm12 = vcmp.eq.s32.totalorder %v3187_v56, %v3467_v16  ;;  %v1525_v57 = vadd.f32 %v1503_v5, %v1371_v12  ;;  %v4497_v5 = vld [vmem:[#allocation57_spill] sm:$0xff]  ;;  %v4502_v12 = vld [vmem:[#allocation39_spill] sm:$0xff] }
 0x4a1   : > { %v1505_v37 = vmul.f32 %v2427_v36, %v3919_v22  ;;  %v1922_v51 = vmul.f32 %v2499_v6, %v3919_v22  ;;  %v1523_v48 = vadd.f32 %v1501_v19, %v1369_v49  ;;  %v1655_v54 = vmul.f32 %v3789_v43, %v3638_v63  ;;  %v4495_v36 = vld [vmem:[#allocation46_spill] sm:$0xff] }
 0x4a2   : > { %v1521_v62 = vadd.f32 %v1499_v44, %v3767_v23  ;;  %vm1533_vm7 = vcmp.eq.s32.totalorder %v3187_v56, %v3578_v55  ;;  %v1679_v10 = vadd.f32 %v1657_v7, %v1525_v57  ;;  %v1519_v6 = vadd.f32 %v1497_v50, %v4495_v36  ;;  %v4499_v44 = vld [vmem:[#allocation53_spill] sm:$0xff]  ;;  %v4504_v7 = vld [vmem:[#allocation23_spill] sm:$0xff]  ;;  %v4505_v50 = vld [vmem:[#allocation32_spill] sm:$0xff] }
 0x4a3   : > { %v1527_v58 = vadd.f32 %v1505_v37, %v1373_v29  ;;  %v1944_v25 = vadd.f32 %v1922_v51, %v1834_v30  ;;  %v2507_v30 = vsel %vm1952_vm4, 1.0, %v4449_v2  ;;  %vm4496_vm14 = vcmask 1040384   ;;  %v4500_v29 = vld [vmem:[#allocation41_spill] sm:$0xff] }
 0x4a4   : > { %v1939_v43 = vadd.f32 %v1917_v38, %v1829_v27  ;;  %v3961_v49 = vadd.f32 %v2025_v59, %v1937_v53  ;;  %v3964_v19 = vadd.f32 %v4497_v5, %v1935_v45  ;;  %v1933_v23 = vadd.f32 %v3832_v13, %v3735_v14  ;;  %v4501_v51 = vld [vmem:[#allocation45_spill] sm:$0xff]  ;;  %v4507_v38 = vld [vmem:[#allocation16_spill] sm:$0xff]  ;;  %v4509_v59 = vld [vmem:[#allocation18_spill] sm:$0xff] }
 0x4a5   : > { %v1681_v40 = vadd.f32 %v1659_v32, %v1527_v58  ;;  %v3950_v61 = vadd.f32 %v4493_v33, %v1944_v25  ;;  %v1931_v37 = vadd.f32 %v4500_v29, %v4499_v44  ;;  %v3972_v32 = vadd.f32 %v4502_v12, %v4501_v51  ;;  %v4506_v25 = vld [vmem:[#allocation21_spill] sm:$0xff]  ;;  %v4510_v27 = vld [vmem:[#allocation15_spill] sm:$0xff]  ;;  %v4511_v5 = vld [vmem:[#allocation68_spill] sm:$0xff] }
 0x4a6   : > { %4498 = vst [vmem:[#allocation48_spill] sm:$0xff] %v3964_v19  ;;  %v1934_v58 = vadd.f32 %v4505_v50, %v4504_v7  ;;  %v1932_v53 = vadd.f32 %v4507_v38, %v4506_v25  ;;  %vm1535_vm4 = vcmp.eq.s32.totalorder %v3187_v56, %v3740_v35  ;;  %v1677_v14 = vadd.f32 %v1655_v54, %v1523_v48  ;;  %v4512_v48 = vld [vmem:[#allocation60_spill] sm:$0xff]  ;;  %v4516_v29 = vld [vmem:[#allocation19_spill] sm:$0xff]  ;;  %v4524_v25 = vld [vmem:[#allocation33_spill] sm:$0xff] }
 0x4a7   : > { %4494 = vst [vmem:[#allocation49_spill] sm:$0xff] %v3950_v61  ;;  %2452 = vmatpush.msk.msra.mxu3 %vm4496_vm14, %v1681_v40  ;;  %v3983_v13 = vadd.f32 %v3812_v39, %v1933_v23  ;;  %v3987_v57 = vadd.f32 %v4510_v27, %v4509_v59  ;;  %v2027_v40 = vmul.f32 %v3792_v1, %v3638_v63  ;;  %v4514_v39 = vld [vmem:[#allocation25_spill] sm:$0xff]  ;;  %v4517_v51 = vld [vmem:[#allocation36_spill] sm:$0xff]  ;;  %v4518_v7 = vld [vmem:[#allocation31_spill] sm:$0xff]  ;;  %v2496_v63 = vsel %vm1853_vm11, 1.0, %v4449_v2 }
 0x4a8   : > { %4503 = vst [vmem:[#allocation50_spill] sm:$0xff] %v3972_v32  ;;  %v3980_v45 = vpop.permute.xlu1 %1608  ;;  %v1675_v36 = vadd.f32 %v3836_v21, %v1521_v62  ;;  %v1517_v44 = vadd.f32 %v4511_v5, %v3729_v17  ;;  %v3998_v54 = vadd.f32 %v4512_v48, %v1931_v37  ;;  %v1936_v12 = vadd.f32 %v4517_v51, %v4516_v29  ;;  %v4520_v62 = vld [vmem:[#allocation24_spill] sm:$0xff]  ;;  %v4528_v5 = vld [vmem:[#allocation63_spill] sm:$0xff] }
 0x4a9   : > { %1702 = vmatpush.msra.mxu3 %v1679_v10  ;;  %4508 = vst [vmem:[#allocation47_spill] sm:$0xff] %v3983_v13  ;;  %v3992_v33 = vmul.f32 %v2507_v30, %v3980_v45  ;;  %v4515_v10 = vld [vmem:[#allocation35_spill] sm:$0xff]  ;;  %v4005_v1 = vadd.f32 %v4518_v7, %v1934_v58  ;;  %v2411_v17 = vsel %vm1379_vm12, 1.0, %v4449_v2  ;;  %v2435_v21 = vsel %vm1535_vm4, 1.0, %v4449_v2  ;;  %v4522_v37 = vld [vmem:[#allocation56_spill] sm:$0xff]  ;;  %v4532_v7 = vld [vmem:[#allocation29_spill] sm:$0xff] }
 0x4aa   : > { %4513 = vst [vmem:[#allocation43_spill] sm:$0xff] %v3998_v54  ;;  %v1938_v23 = vadd.f32 %v4515_v10, %v4514_v39  ;;  %v4020_v30 = vadd.f32 %v4520_v62, %v1932_v53  ;;  %v1673_v50 = vadd.f32 %v4522_v37, %v1519_v6  ;;  %v4523_v58 = vld [vmem:[#allocation64_spill] sm:$0xff]  ;;  %v2518_v27 = vsel %vm1963_vm15, 1.0, %v4449_v2 }
 0x4ab   : > { %1703 = vmatpush.msra.mxu3 %v1677_v14  ;;  %4519 = vst [vmem:[#allocation55_spill] sm:$0xff] %v4005_v1  ;;  %vm1377_vm2 = vcmp.eq.s32.totalorder %v3187_v56, %v4523_v58  ;;  %v4526_v14 = vld [vmem:[#allocation22_spill] sm:$0xff]  ;;  %v2387_v53 = vsel %vm1234_vm13, 1.0, %v4449_v2  ;;  %v2433_v6 = vsel %vm1533_vm7, 1.0, %v4449_v2  ;;  %v1489_v48 = vmul.f32 %v2411_v17, %v4528_v5  ;;  %v4529_v39 = vld [vmem:[#allocation52_spill] sm:$0xff] }
 0x4ac   : > { %4521 = vst [vmem:[#allocation58_spill] sm:$0xff] %v4020_v30  ;;  %v4026_v38 = vadd.f32 %v4524_v25, %v1938_v23  ;;  %v4029_v59 = vadd.f32 %v4526_v14, %v1936_v12  ;;  %vm1531_vm0 = vcmp.eq.s32.totalorder %v3187_v56, %v4529_v39  ;;  %v1645_v10 = vmul.f32 %v2435_v21, %v3980_v45  ;;  %v4530_v23 = vld [vmem:[#allocation65_spill] sm:$0xff]  ;;  %v4533_v21 = vld [vmem:[#allocation66_spill] sm:$0xff]  ;;  %v4064_v14 = vpop.permute.xlu2 %1600 }
 0x4ad   : > { %1704 = vmatpush.msra.mxu3 %v1675_v36  ;;  %v4043_v36 = vadd.f32 %v2027_v40, %v1939_v43  ;;  %v1671_v29 = vadd.f32 %v4530_v23, %v1517_v44  ;;  %v1919_v51 = vmul.f32 %v2496_v63, %v3660_v0  ;;  %v2409_v12 = vsel %vm1377_vm2, 1.0, %v4449_v2  ;;  %v4531_v40 = vld [vmem:[#allocation13_spill] sm:$0xff] }
 0x4ae   : > { %4525 = vst [vmem:[#allocation46_spill] sm:$0xff] %v4026_v38  ;;  %v2481_v43 = vsel %vm1838_vm1, 1.0, %v4449_v2  ;;  %v1357_v17 = vmul.f32 %v4532_v7, %v4531_v40  ;;  %v1643_v62 = vmul.f32 %v2433_v6, %v3860_v42  ;;  %v1831_v37 = vmul.f32 %v4533_v21, %v4491_v11  ;;  %v4535_v6 = vld [vmem:[#allocation28_spill] sm:$0xff]  ;;  %v4538_v38 = vld [vmem:[#allocation37_spill] sm:$0xff] }
 0x4af   : > { %4527 = vst [vmem:[#allocation57_spill] sm:$0xff] %v4029_v59  ;;  %1705 = vmatpush.msra.mxu3 %v1673_v50  ;;  %v2029_v44 = vmul.f32 %v2518_v27, %v3737_v28  ;;  %v4534_v50 = vld [vmem:[#allocation61_spill] sm:$0xff]  ;;  %v2431_v25 = vsel %vm1531_vm0, 1.0, %v4449_v2  ;;  %v4537_v27 = vld [vmem:[#allocation42_spill] sm:$0xff]  ;;  %vm1375_vm10 = vcmp.eq.s32.totalorder %v3187_v56, %v3856_v18  ;;  %vm1232_vm11 = vcmp.eq.s32.totalorder %v3187_v56, %v3581_v46 }
 0x4b0   : > { %v1355_v63 = vmul.f32 %v2387_v53, %v4534_v50  ;;  %v1511_v21 = vadd.f32 %v1489_v48, %v1357_v17  ;;  %v1941_v59 = vadd.f32 %v1919_v51, %v1831_v37  ;;  %v1940_v53 = vadd.f32 %v4538_v38, %v4537_v27  ;;  %v4539_v48 = vld [vmem:[#allocation26_spill] sm:$0xff]  ;;  %v4543_v51 = vld [vmem:[#allocation44_spill] sm:$0xff]  ;;  %v4115_v37 = vpop.permute.xlu0 %1300 }
 0x4b1   : > { %1706 = vmatpush.msra.mxu3 %v1671_v29  ;;  %v4066_v23 = vpop.permute.xlu1 %1446  ;;  %v4536_v29 = vld [vmem:[#allocation20_spill] sm:$0xff]  ;;  %v1641_v61 = vmul.f32 %v2431_v25, %v4064_v14  ;;  %vm1396_vm1 = vcmp.eq.s32.totalorder %v4539_v48, %v3613_v47  ;;  %vm1253_vm5 = vcmp.eq.s32.totalorder %v4539_v48, %v3397_v4  ;;  %vm1529_vm13 = vcmp.eq.s32.totalorder %v3187_v56, %v3911_v20  ;;  %v4544_v17 = vld [vmem:[#allocation54_spill] sm:$0xff] }
 0x4b2   : > { %v1487_v30 = vmul.f32 %v2409_v12, %v4066_v23  ;;  %v4070_v7 = vmul.f32 %v2481_v43, %v4066_v23  ;;  %v1667_v1 = vadd.f32 %v1645_v10, %v4536_v29  ;;  %v1665_v32 = vadd.f32 %v1643_v62, %v1511_v21 }
 0x4b3   : > { %1707 = vmatpush.msra.mxu3 %v4535_v6  ;;  %v4077_v13 = vadd.f32 %v2029_v44, %v1941_v59  ;;  %v2479_v43 = vsel %vm1836_vm9, 1.0, %v4449_v2  ;;  %vm1394_vm9 = vcmp.eq.s32.totalorder %v4539_v48, %v3341_v26  ;;  %v4542_v59 = vld [vmem:[#allocation27_spill] sm:$0xff]  ;;  %v2406_v10 = vsel %vm1253_vm5, 1.0, %v4449_v2 }
 0x4b4   : > { %v1509_v54 = vadd.f32 %v1487_v30, %v1355_v63  ;;  %v2407_v30 = vsel %vm1375_vm10, 1.0, %v4449_v2  ;;  %vm1251_vm15 = vcmp.eq.s32.totalorder %v4539_v48, %v4542_v59  ;;  %v1942_v62 = vadd.f32 %v4544_v17, %v4543_v51 }
 0x4b5   : > { %1708 = vmatpush.msra.mxu3 %v1667_v1  ;;  %vm1550_vm12 = vcmp.eq.s32.totalorder %v4539_v48, %v3434_v15  ;;  %vm1548_vm7 = vcmp.eq.s32.totalorder %v4539_v48, %v3371_v31  ;;  %v2385_v26 = vsel %vm1232_vm11, 1.0, %v4449_v2  ;;  %v2426_v63 = vsel %vm1394_vm9, 1.0, %v4449_v2 }
 0x4b6   : > { %v1663_v12 = vadd.f32 %v1641_v61, %v1509_v54  ;;  %v2428_v61 = vsel %vm1396_vm1, 1.0, %v4449_v2  ;;  %v4540_v54 = vld [vmem:[#allocation51_spill] sm:$0xff]  ;;  %v1374_v56 = vmul.f32 %v2406_v10, %v3840_v8  ;;  %v2429_v6 = vsel %vm1529_vm13, 1.0, %v4449_v2 }
 0x4b7   : > { %1709 = vmatpush.msra.mxu3 %v1665_v32  ;;  %v4098_v1 = vadd.f32 %v4540_v54, %v1940_v53  ;;  %v1506_v44 = vmul.f32 %v2428_v61, %v3919_v22  ;;  %v2501_v29 = vsel %vm1946_vm3, 1.0, %v4449_v2  ;;  %v2404_v31 = vsel %vm1251_vm15, 1.0, %v4449_v2  ;;  %v4545_v10 = vld [vmem:[#allocation11_spill] sm:$0xff] }
 0x4b8   : > { %v2450_v21 = vsel %vm1550_vm12, 1.0, %v4449_v2  ;;  %v2448_v27 = vsel %vm1548_vm7, 1.0, %v4449_v2  ;;  %v1353_v53 = vmul.f32 %v2385_v26, %v4115_v37  ;;  %vm1683_vm3 = vcmp.eq.s32.totalorder %v4545_v10, 0  ;;  %v4546_v26 = vld [vmem:[#allocation59_spill] sm:$0xff] }
 0x4b9   : > { %1710 = vmatpush.msra.mxu3 %v1663_v12  ;;  %v4087_v38 = vpop.permute.xlu1 %1442  ;;  %4541 = vst [vmem:[#allocation53_spill] sm:$0xff] %v4098_v1  ;;  %v1504_v12 = vmul.f32 %v2426_v63, %v3660_v0  ;;  %v1372_v51 = vmul.f32 %v2404_v31, %v4491_v11  ;;  %v1660_v17 = vmul.f32 %v2450_v21, %v4492_v41  ;;  %vm1686_vm14 = vcmask 662528  }
 0x4ba   : > { %v4092_v32 = vmul.f32 %v2479_v43, %v4087_v38  ;;  %v1485_v25 = vmul.f32 %v2407_v30, %v4087_v38  ;;  %v1528_v43 = vadd.f32 %v1506_v44, %v1374_v56  ;;  %v1658_v1 = vmul.f32 %v2448_v27, %v3737_v28  ;;  %v4550_v28 = vld [vmem:[#allocation14_spill] sm:$0xff] }
 0x4bb   : > { %v4142_v19 = vadd.f32 %v4546_v26, %v1942_v62  ;;  %v1526_v63 = vadd.f32 %v1504_v12, %v1372_v51  ;;  %v4145_v56 = vsel %vm1683_vm3, 1.0, %v4449_v2  ;;  %vm4548_vm2 = vcmask 1040384   ;;  %v4551_v62 = vld [vmem:[#allocation67_spill] sm:$0xff]  ;;  %v4552_v27 = vld [vmem:[#allocation34_spill] sm:$0xff]  ;;  %v4554_v26 = vld [vmem:[#allocation69_spill] sm:$0xff] }
 0x4bc   : > { %v1507_v59 = vadd.f32 %v1485_v25, %v1353_v53  ;;  %v1682_v44 = vadd.f32 %v1660_v17, %v1528_v43  ;;  %v4549_v25 = vld [vmem:[#allocation12_spill] sm:$0xff]  ;;  %vm1380_vm1 = vcmp.eq.s32.totalorder %v4539_v48, %v3467_v16  ;;  %vm1536_vm10 = vcmp.eq.s32.totalorder %v4539_v48, %v3740_v35  ;;  %v4553_v53 = vld [vmem:[#allocation30_spill] sm:$0xff] }
 0x4bd   : > { %v1680_v11 = vadd.f32 %v1658_v1, %v1526_v63  ;;  %vm1237_vm0 = vcmp.eq.s32.totalorder %v4539_v48, %v4549_v25  ;;  %vm1378_vm5 = vcmp.eq.s32.totalorder %v4539_v48, %v4523_v58  ;;  %vm1235_vm11 = vcmp.eq.s32.totalorder %v4539_v48, %v3500_v34 }
 0x4be   : > { %vm1534_vm9 = vcmp.eq.s32.totalorder %v4539_v48, %v3578_v55  ;;  %v2390_v1 = vsel %vm1237_vm0, 1.0, %v4449_v2  ;;  %v2412_v21 = vsel %vm1380_vm1, 1.0, %v4449_v2  ;;  %vm1855_vm15 = vcmp.eq.s32.totalorder %v3310_v3, %v3613_v47 }
 0x4bf   : > { %vm1767_vm13 = vcmp.eq.s32.totalorder %v3310_v3, %v3397_v4  ;;  %v2436_v43 = vsel %vm1536_vm10, 1.0, %v4449_v2  ;;  %v2434_v51 = vsel %vm1534_vm9, 1.0, %v4449_v2  ;;  %vm1233_vm12 = vcmp.eq.s32.totalorder %v4539_v48, %v3581_v46 }
 0x4c0   : > { %vm1376_vm7 = vcmp.eq.s32.totalorder %v4539_v48, %v3856_v18  ;;  %v1490_v47 = vmul.f32 %v2412_v21, %v4528_v5  ;;  %v2498_v17 = vsel %vm1855_vm15, 1.0, %v4449_v2  ;;  %vm1532_vm3 = vcmp.eq.s32.totalorder %v4539_v48, %v4529_v39 }
 0x4c1   : > { %v1644_v21 = vmul.f32 %v2434_v51, %v3860_v42  ;;  %vm4557_vm0 = vcmask 1040384   ;;  %vm1839_vm1 = vcmp.eq.s32.totalorder %v3310_v3, %v3467_v16  ;;  %vm1951_vm10 = vcmp.eq.s32.totalorder %v3310_v3, %v3740_v35 }
 0x4c2   : > { %v4131_v61 = vpop.permute.xlu1 %1596  ;;  %vm1749_vm9 = vcmp.eq.s32.totalorder %v3310_v3, %v3500_v34  ;;  %vm1949_vm15 = vcmp.eq.s32.totalorder %v3310_v3, %v3578_v55  ;;  %v2482_v35 = vsel %vm1839_vm1, 1.0, %v4449_v2  ;;  %v2506_v16 = vsel %vm1951_vm10, 1.0, %v4449_v2 }
 0x4c3   : > { %v1639_v54 = vmul.f32 %v2429_v6, %v4131_v61  ;;  %v4135_v30 = vmul.f32 %v2501_v29, %v4131_v61  ;;  %v4547_v6 = vld [vmem:[#allocation17_spill] sm:$0xff]  ;;  %v1928_v29 = vadd.f32 %v4551_v62, %v4550_v28  ;;  %v2408_v28 = vsel %vm1376_vm7, 1.0, %v4449_v2 }
 0x4c4   : > { %vm1540_vm4 = vcmp.eq.s32.totalorder %v4539_v48, %v4547_v6  ;;  %v4555_v6 = vld [vmem:[#allocation38_spill] sm:$0xff]  ;;  %v1486_v4 = vmul.f32 %v2408_v28, %v4087_v38  ;;  %v2504_v55 = vsel %vm1949_vm15, 1.0, %v4449_v2  ;;  %vm2055_vm7 = vcmp.eq.s32.totalorder %v4545_v10, 1  ;;  %v4568_v10 = vld [vmem:[#allocation55_spill] sm:$0xff] }
 0x4c5   : > { %v1661_v0 = vadd.f32 %v1639_v54, %v1507_v59  ;;  %v2440_v31 = vsel %vm1540_vm4, 1.0, %v4449_v2  ;;  %v2410_v54 = vsel %vm1378_vm5, 1.0, %v4449_v2  ;;  %v2388_v59 = vsel %vm1235_vm11, 1.0, %v4449_v2 }
 0x4c6   : > { %v1650_v12 = vmul.f32 %v2440_v31, %v4553_v53  ;;  %v1488_v63 = vmul.f32 %v2410_v54, %v4066_v23  ;;  %vm1530_vm4 = vcmp.eq.s32.totalorder %v4539_v48, %v3911_v20  ;;  %v1356_v62 = vmul.f32 %v2388_v59, %v4534_v50  ;;  %v4556_v53 = vld [vmem:[#allocation40_spill] sm:$0xff] }
 0x4c7   : > { %1711 = vmatpush.msra.mxu3 %v1661_v0  ;;  %v2476_v31 = vsel %vm1767_vm13, 1.0, %v4449_v2  ;;  %vm1837_vm5 = vcmp.eq.s32.totalorder %v3310_v3, %v4523_v58  ;;  %vm1751_vm11 = vcmp.eq.s32.totalorder %v3310_v3, %v4549_v25  ;;  %v2458_v25 = vsel %vm1749_vm9, 1.0, %v4449_v2 }
 0x4c8   : > { %2453 = vmatmul.msk.f32.vlgmr.msra.gmra.mxu3 %vm1686_vm14, %v4145_v56  ;;  %v1672_v0 = vadd.f32 %v1650_v12, %v4554_v26  ;;  %v1510_v54 = vadd.f32 %v1488_v63, %v1356_v62  ;;  %v1833_v59 = vmul.f32 %v2476_v31, %v3840_v8  ;;  %v2460_v34 = vsel %vm1751_vm11, 1.0, %v4449_v2  ;;  %v4561_v31 = vld [vmem:[#allocation43_spill] sm:$0xff] }
 0x4c9   : > { %2454 = vmatpush.msk.msrb.mxu3 %vm4548_vm2, %v1682_v44  ;;  %v1646_v44 = vmul.f32 %v2436_v43, %v3980_v45  ;;  %vm1965_vm2 = vcmp.eq.s32.totalorder %v3310_v3, %v3434_v15  ;;  %v4238_v15 = vadd.f32 %v3992_v33, %v3987_v57  ;;  %v4558_v33 = vld [vmem:[#allocation62_spill] sm:$0xff]  ;;  %vm1947_vm13 = vcmp.eq.s32.totalorder %v3310_v3, %v4529_v39 }
 0x4ca   : > { %v2520_v26 = vsel %vm1965_vm2, 1.0, %v4449_v2  ;;  %v1926_v58 = vadd.f32 %v4070_v7, %v4558_v33  ;;  %v1817_v39 = vmul.f32 %v2460_v34, %v4531_v40  ;;  %v1815_v62 = vmul.f32 %v2458_v25, %v4534_v50 }
 0x4cb   : > { %1722 = vmatpush.msrb.mxu3 %v1680_v11  ;;  %v1358_v11 = vmul.f32 %v2390_v1, %v4531_v40  ;;  %v2432_v1 = vsel %vm1532_vm3, 1.0, %v4449_v2  ;;  %v1668_v12 = vadd.f32 %v1646_v44, %v4556_v53  ;;  %v2031_v44 = vmul.f32 %v2520_v26, %v4492_v41  ;;  %vm4564_vm3 = vmmov %vm4557_vm0 }
 0x4cc   : > { %v2457_v41 = vsel %vm1748_vm8, 1.0, %v4449_v2  ;;  %vm1835_vm8 = vcmp.eq.s32.totalorder %v3310_v3, %v3856_v18  ;;  %v4559_v18 = vld [vmem:[#allocation48_spill] sm:$0xff]  ;;  %v2522_v53 = vsel %vm2055_vm7, 1.0, %v4449_v2  ;;  %vm2166_vm1 = vcmask 936962  }
 0x4cd   : > { %1723 = vmatpush.msrb.mxu3 %v4552_v27  ;;  %v2430_v27 = vsel %vm1530_vm4, 1.0, %v4449_v2  ;;  %v1512_v43 = vadd.f32 %v1490_v47, %v1358_v11  ;;  %v1814_v24 = vmul.f32 %v2457_v41, %v4115_v37  ;;  %v2017_v11 = vmul.f32 %v2506_v16, %v3980_v45 }
 0x4ce   : > { %vm1739_vm4 = vcmask 1041408  }
 0x4cf   : > { %1724 = vmatpush.msrb.mxu3 %v3913_v9  ;;  %v4195_v9 = vadd.f32 %v4555_v6, %v1928_v29  ;;  %v1921_v29 = vmul.f32 %v2498_v17, %v3919_v22  ;;  %v1642_v22 = vmul.f32 %v2432_v1, %v4064_v14  ;;  %v1640_v17 = vmul.f32 %v2430_v27, %v4131_v61  ;;  %vm2167_vm11 = vmor %vm2166_vm1, %vm1739_vm4 }
 0x4d0   : > { %v1666_v48 = vadd.f32 %v1644_v21, %v1512_v43  ;;  %v1924_v7 = vadd.f32 %v4092_v32, %v1814_v24  ;;  %v1905_v6 = vmul.f32 %v2482_v35, %v4528_v5  ;;  %v2015_v32 = vmul.f32 %v2504_v55, %v3860_v42  ;;  %v4560_v5 = vld [vmem:[#allocation47_spill] sm:$0xff]  ;;  %v4562_v21 = vld [vmem:[#allocation50_spill] sm:$0xff] }
 0x4d1   : > { %1725 = vmatpush.msrb.mxu3 %v3916_v60  ;;  %v2386_v60 = vsel %vm1233_vm12, 1.0, %v4449_v2  ;;  %vm1945_vm12 = vcmp.eq.s32.totalorder %v3310_v3, %v3911_v20  ;;  %v4569_v43 = vld [vmem:[#allocation58_spill] sm:$0xff] }
 0x4d2   : > { %v1354_v51 = vmul.f32 %v2386_v60, %v4115_v37  ;;  %v1927_v60 = vadd.f32 %v1905_v6, %v1817_v39 }
 0x4d3   : > { %1726 = vmatpush.msrb.mxu3 %v1672_v0  ;;  %v1664_v0 = vadd.f32 %v1642_v22, %v1510_v54 }
 0x4d4   : > { %v1508_v47 = vadd.f32 %v1486_v4, %v1354_v51  ;;  %v2037_v1 = vadd.f32 %v2015_v32, %v1927_v60  ;;  %v669_v51 = vld [vmem:[%s654_s0] sm:$0xf] }
 0x4d5   : > { %1727 = vmatpush.msrb.mxu3 %v3922_v52  ;;  %v1943_v52 = vadd.f32 %v1921_v29, %v1833_v59 }
 0x4d6   : > { %v1662_v8 = vadd.f32 %v1640_v17, %v1508_v47 }
 0x4d7   : > { %1728 = vmatpush.msrb.mxu3 %v1668_v12  ;;  %v2053_v63 = vadd.f32 %v2031_v44, %v1943_v52  ;;  %v4563_v12 = vld [vmem:[#allocation49_spill] sm:$0xff] }
 0x4d9   : > { %1729 = vmatpush.msrb.mxu3 %v1666_v48 }
 0x4db   : > { %1730 = vmatpush.msrb.mxu3 %v1664_v0 }
 0x4dd   : > { %1731 = vmatpush.msrb.mxu3 %v1662_v8 }
 0x4de   : > { %2455 = vmatmul.msk.f32.vlgmr.msrb.gmra.mxu3 %vm1686_vm14, %v4145_v56  ;;  %v2503_v56 = vsel %vm1948_vm6, 1.0, %v4449_v2  ;;  %vm1747_vm6 = vcmp.eq.s32.totalorder %v3310_v3, %v3581_v46  ;;  %v2034_v46 = vadd.f32 %v4135_v30, %v1924_v7  ;;  %v2500_v3 = vsel %vm1945_vm12, 1.0, %v4449_v2 }
 0x4df   : > { %2523 = vmatpush.msk.msra.mxu3 %vm4557_vm0, %v2053_v63  ;;  %v2014_v57 = vmul.f32 %v2503_v56, %v4064_v14  ;;  %v2456_v45 = vsel %vm1747_vm6, 1.0, %v4449_v2  ;;  %v2039_v30 = vadd.f32 %v2017_v11, %v4562_v21  ;;  %v2011_v29 = vmul.f32 %v2500_v3, %v4131_v61  ;;  %v4567_v61 = vld [vmem:[#allocation57_spill] sm:$0xff] }
 0x4e0   : > { %v1813_v50 = vmul.f32 %v2456_v45, %v4115_v37  ;;  %v4566_v37 = vld [vmem:[#allocation46_spill] sm:$0xff] }
 0x4e1   : > { %2073 = vmatpush.msra.mxu3 %v4077_v13  ;;  %v2480_v13 = vsel %vm1837_vm5, 1.0, %v4449_v2 }
 0x4e2   : > { %v1903_v28 = vmul.f32 %v2480_v13, %v4066_v23  ;;  %v2502_v23 = vsel %vm1947_vm13, 1.0, %v4449_v2 }
 0x4e3   : > { %2074 = vmatpush.msra.mxu3 %v4043_v36  ;;  %v2036_v36 = vadd.f32 %v2014_v57, %v1926_v58  ;;  %v2013_v42 = vmul.f32 %v2502_v23, %v4064_v14  ;;  %v4565_v14 = vld [vmem:[#allocation53_spill] sm:$0xff] }
 0x4e4   : > { %v1925_v40 = vadd.f32 %v1903_v28, %v1815_v62 }
 0x4e5   : > { %2075 = vmatpush.msra.mxu3 %v3961_v49  ;;  %v2478_v49 = vsel %vm1835_vm8, 1.0, %v4449_v2 }
 0x4e6   : > { %v1901_v20 = vmul.f32 %v2478_v49, %v4087_v38  ;;  %v2035_v27 = vadd.f32 %v2013_v42, %v1925_v40 }
 0x4e7   : > { %2076 = vmatpush.msra.mxu3 %v4559_v18 }
 0x4e8   : > { %v1923_v4 = vadd.f32 %v1901_v20, %v1813_v50 }
 0x4e9   : > { %2077 = vmatpush.msra.mxu3 %v4560_v5 }
 0x4ea   : > { %v2033_v38 = vadd.f32 %v2011_v29, %v1923_v4 }
 0x4eb   : > { %2078 = vmatpush.msra.mxu3 %v4561_v31 }
 0x4ed   : > { %2079 = vmatpush.msra.mxu3 %v2039_v30 }
 0x4ef   : > { %2080 = vmatpush.msra.mxu3 %v2037_v1 }
 0x4f1   : > { %2081 = vmatpush.msra.mxu3 %v2035_v27 }
 0x4f3   : > { %2082 = vmatpush.msra.mxu3 %v2033_v38 }
 0x4f4   : > { %2524 = vmatmul.msk.f32.vlgmr.msra.gmra.mxu3 %vm1686_vm14, %v2522_v53 }
 0x4f5   : > { %2525 = vmatpush.msk.msrb.mxu3 %vm4564_vm3, %v4563_v12 }
 0x4f7   : > { %2093 = vmatpush.msrb.mxu3 %v4142_v19 }
 0x4f9   : > { %2094 = vmatpush.msrb.mxu3 %v4565_v14 }
 0x4fb   : > { %2095 = vmatpush.msrb.mxu3 %v4566_v37 }
 0x4fd   : > { %2096 = vmatpush.msrb.mxu3 %v4567_v61 }
 0x4ff   : > { %2097 = vmatpush.msrb.mxu3 %v4568_v10 }
 0x501   : > { %2098 = vmatpush.msrb.mxu3 %v4569_v43 }
 0x503   : > { %2099 = vmatpush.msrb.mxu3 %v4238_v15  ;;  %v2688_v15 = vmov 269488144  }
 0x504   : > { %v2127_v41 = vunpack.c.l.s4 %v2688_v15 }
 0x505   : > { %2100 = vmatpush.msrb.mxu3 %v4195_v9 }
 0x506   : > { %v2128_v56 = vunpack.c.0.s8 %v2127_v41 }
 0x507   : > { %2101 = vmatpush.msrb.mxu3 %v2036_v36 }
 0x509   : > { %2102 = vmatpush.msrb.mxu3 %v2034_v46 }
 0x50a   : > { %2526 = vmatmul.msk.f32.vlgmr.msrb.gmra.mxu3 %vm1686_vm14, %v2522_v53  ;;  %vm2120_vm14 = vcmask 934912  }
 0x54b   : > { %v1713_v2 = vpop.f32.mrf.mxu3 }
 0x561   : > { %v1733_v19 = vpop.f32.mrf.mxu3 }
 0x562   : > { %v1738_v59 = vrot.slane %v1733_v19, 6 }
 0x564   : > { %v1740_v22 = vsel %vm1739_vm4, %v1713_v2, %v1738_v59 }
 0x565   : > { %v1742_v9 = vadd.f32 %v1740_v22, %v669_v51 }
 0x577   : > { %v2084_v54 = vpop.f32.mrf.mxu3 }
 0x58d   : > { %v2104_v17 = vpop.f32.mrf.mxu3 }
 0x58e   : > { %v2109_v48 = vrot.slane %v2104_v17, 6 }
 0x590   : > { %v2110_v26 = vsel %vm1739_vm4, %v2084_v54, %v2109_v48 }
 0x591   : > { %v2112_v52 = vadd.f32 %v2110_v26, %v1742_v9 }
 0x593   : > { %2114 = vst [vmem:[#allocation1] ss:$4 sm:$0xff] %v2112_v52 }
 0x59a   : > { %v2115_v0 = vld.sshfl [vmem:[#allocation1] sm:$0xff pattern:$0x73625140]  ;;  %v2116_v47 = vld.sshfl [vmem:[#allocation1 + $0x8] sm:$0xff pattern:$0x73625140] }
 0x59b   : > { %v2119_v44 = vsel %vm1739_vm4, %v2115_v0, -inf  ;;  %v2121_v8 = vsel %vm2120_vm14, %v2116_v47, -inf }
 0x59c   : > { %v2122_v63 = vmax.f32 %v2119_v44, %v2121_v8 }
 0x59e   : > { %2123 = vmax.xlane.f32.xlu2 %v2122_v63 }
 0x611   : > { %v2124_v35 = vpop.xlane.xlu2 %2123 }
 0x612   : > { %v2129_v16 = vperm.slane %v2124_v35, %v2128_v56 }
 0x614   : > { %v2131_v24 = vsub.f32 %v2112_v52, %v2129_v16 }
 0x616   : > { %v2132_v57 = vmul.f32 1.442695, %v2131_v24 }
 0x618   : > { %2615 = vpow2.f32 %v2132_v57 }
 0x61e   : > { %v2616_v13 = vpop.eup %2615 }
 0x61f   : > { %2135 = vst [vmem:[#allocation1] ss:$4 sm:$0xff] %v2616_v13 }
 0x626   : > { %v2136_v33 = vld.sshfl [vmem:[#allocation1] sm:$0xff pattern:$0x73625140]  ;;  %v2137_v58 = vld.sshfl [vmem:[#allocation1 + $0x8] sm:$0xff pattern:$0x73625140] }
 0x627   : > { %v2140_v34 = vsel %vm1739_vm4, %v2136_v33, 0.0  ;;  %v2141_v25 = vsel %vm2120_vm14, %v2137_v58, 0.0 }
 0x628   : > { %v2142_v55 = vadd.f32 %v2141_v25, %v2140_v34 }
 0x62a   : > { %2143 = vadd.xlane.f32.xlu0 %v2142_v55 }
 0x69d   : > { %v2144_v36 = vpop.xlane.xlu0 %2143 }
 0x69e   : > { %v2149_v7 = vperm.slane %v2144_v36, %v2128_v56 }
 0x6a0   : > { %2617 = vrcp.f32 %v2149_v7  ;;  %v2162_v18 = vand.u32 2147483648, %v2149_v7  ;;  %v2160_v46 = vand.u32 2147483647, %v2149_v7  ;;  %vm2156_vm0 = vweird.f32 %v2149_v7 }
 0x6a2   : > { %v2163_v62 = vor.u32 1.1754944e-38, %v2162_v18  ;;  %vm2161_vm5 = vcmp.eq.f32.partialorder %v2160_v46, 8.507059e+37 }
 0x6a6   : > { %v2618_v6 = vpop.eup %2617 }
 0x6a7   : > { %v2152_v11 = vmul.f32 %v2618_v6, %v2149_v7  ;;  %vm2157_vm2 = vweird.f32 %v2618_v6 }
 0x6a8   : > { %vm2158_vm10 = vmor %vm2156_vm0, %vm2157_vm2 }
 0x6a9   : > { %v2153_v28 = vsub.f32 1.0, %v2152_v11 }
 0x6ab   : > { %v2154_v49 = vmul.f32 %v2618_v6, %v2153_v28 }
 0x6ad   : > { %v2155_v39 = vadd.f32 %v2618_v6, %v2154_v49 }
 0x6af   : > { %v2159_v32 = vsel %vm2158_vm10, %v2618_v6, %v2155_v39 }
 0x6b0   : > { %v2164_v5 = vsel %vm2161_vm5, %v2163_v62, %v2159_v32 }
 0x6b1   : > { %v2165_v45 = vmul.f32 %v2616_v13, %v2164_v5 }
 0x6b3   : > { %2168 = vst.msk [vmem:[%s629_s25] sm:$0xf] %vm2167_vm11, %v2165_v45 }
 0x6b4   : > { %2646 = shalt.err (!%p2643_p3)
}
 0x6b5   : > { %2537 = dma.vmem_to_hbm [thread:$0]  (%p2825_p5), %s2188_s26, 64, %s2190_s28, %s2170_s12  }
 0x6b6 PF: > { %s4570_s1 = sld [smem:[#allocation6_spill]]  ;;  %p2543_p4 = scmp.ge.s32.totalorder %s2681_s19, 2 }
 0x6b8   : > { %p2540_p7 = pnand %p2543_p4, %p2829_p6 }
 0x6ba   : > { %p2541_p8 = pneg %p2540_p7 }
 0x6bc   : > { %s2204_s25 = sand.u32 1, %s4570_s1  }
 0x6bd   : > { %s2205_s0 = scalar_lea.sflag [#allocation4], %s2204_s25 }
 0x6be   : > { %2664 = dma.done.wait (%p2541_p8), %s2205_s0, 64  }
 0x6bf   : > { %2666 = vsyncadd (%p2541_p8), %s2205_s0, 4294967232  ;;  %s4572_s19 = sld [smem:[#allocation8_spill]]  ;;  %s4575_s29 = smov %s2673_s30 }
 0x6c0   : > { %s4573_s27 = sld [smem:[#allocation7_spill]] }
 0x6c1   : > { %s4574_s0 = sld [smem:[#allocation9_spill]] }
 0x6c5   : > { %p31_p9 = scmp.ge.s32.totalorder %s4572_s19, 4  }
 0x6c6   : > { %s4576_s30 = smov %s4573_s27 }
 0x6c7   :  { %33 = sbr.rel (!%p31_p9) target bundleno = 7 (0x7), region = 147 }
 0x6cc   :  { %2218 = vsyncpa [#allocation4], 1 }
 0x6cd   :  { %2220 = vsyncpa [#allocation4 + $0x1], 1 }

</bundles_post_ra>
